<compile_context>
chip_gen: v6e
topology: v6e:2x2x1
jax: 0.10.0
libtpu: 0.0.40
codegen_flags: <defaults>
</compile_context>

<pallas_src>
import jax
import jax.numpy as jnp
from jax.experimental import pallas as pl
from jax.experimental.pallas import tpu as pltpu

EPS = 1e-5


# ----------------------------------------------------------------------------
# In-kernel helpers
# ----------------------------------------------------------------------------
def _zero_border(pad_ref, hp, wp, c):
    """Zero only the 1-pixel border of a (hp, wp, c) padded scratch buffer.

    The interior is fully overwritten every grid step, so a full-buffer zero
    sweep is unnecessary; re-zeroing the border every step (instead of once at
    program_id==0) keeps this correct when the batch grid axis is sharded
    across TensorCores (scratch is per-core and uninitialized).
    """
    zrow = jnp.zeros((1, wp, c), jnp.float32)
    pad_ref[0:1, :, :] = zrow
    pad_ref[hp - 1:hp, :, :] = zrow
    zcol = jnp.zeros((hp, 1, c), jnp.float32)
    pad_ref[:, 0:1, :] = zcol
    pad_ref[:, wp - 1:wp, :] = zcol


# ----------------------------------------------------------------------------
# Pallas kernel: MaxPool2d(2) -> (Conv3x3 + BN(eval,folded) + ReLU) x 2
# ----------------------------------------------------------------------------
def make_down_kernel(Ho, Wo, Cin, Cout):
    Hp, Wp = Ho + 2, Wo + 2

    def kernel(x_ref, w1_ref, b1_ref, w2_ref, b2_ref, o_ref,
               pad1, patch1, pad2, patch2):
        # ---- MaxPool2d(2): strided loads straight from the NHWC tile -------
        p00 = x_ref[pl.ds(0, Ho, stride=2), pl.ds(0, Wo, stride=2), :]
        p01 = x_ref[pl.ds(0, Ho, stride=2), pl.ds(1, Wo, stride=2), :]
        p10 = x_ref[pl.ds(1, Ho, stride=2), pl.ds(0, Wo, stride=2), :]
        p11 = x_ref[pl.ds(1, Ho, stride=2), pl.ds(1, Wo, stride=2), :]
        pooled = jnp.maximum(jnp.maximum(p00, p01), jnp.maximum(p10, p11))

        # ---- conv1 (3x3, pad 1) as ONE im2col matmul ------------------------
        _zero_border(pad1, Hp, Wp, Cin)
        pad1[1:Ho + 1, 1:Wo + 1, :] = pooled
        for k in range(9):                       # build (Ho, Wo, 9*Cin) patches
            dy, dx = k // 3, k % 3
            patch1[:, :, k * Cin:(k + 1) * Cin] = pad1[dy:dy + Ho, dx:dx + Wo, :]
        y1 = jnp.dot(patch1[...].reshape(Ho * Wo, 9 * Cin), w1_ref[...],
                     preferred_element_type=jnp.float32)
        y1 = jnp.maximum(y1 + b1_ref[...], 0.0)          # folded-BN bias + ReLU

        # ---- conv2 (3x3, pad 1) as ONE im2col matmul ------------------------
        _zero_border(pad2, Hp, Wp, Cout)
        pad2[1:Ho + 1, 1:Wo + 1, :] = y1.reshape(Ho, Wo, Cout)
        for k in range(9):                       # build (Ho, Wo, 9*Cout) patches
            dy, dx = k // 3, k % 3
            patch2[:, :, k * Cout:(k + 1) * Cout] = pad2[dy:dy + Ho, dx:dx + Wo, :]
        y2 = jnp.dot(patch2[...].reshape(Ho * Wo, 9 * Cout), w2_ref[...],
                     preferred_element_type=jnp.float32)
        o_ref[...] = jnp.maximum(y2 + b2_ref[...], 0.0).astype(o_ref.dtype)

    return kernel


# ----------------------------------------------------------------------------
# Wrapper: parameter folding + pallas_call
# ----------------------------------------------------------------------------
def _fold_bn(conv_b, gamma, beta, mean, var):
    scale = gamma / jnp.sqrt(var + EPS)          # folded into conv weights
    bias = (conv_b - mean) * scale + beta        # folded into per-channel bias
    return scale, bias


def pallas_down(x_nhwc, p):
    """One Down layer: (N, H, W, Cin) NHWC -> (N, H//2, W//2, Cout) NHWC."""
    N, H, W, Cin = x_nhwc.shape
    Ho, Wo = H // 2, W // 2
    Cout = p["w1"].shape[0]

    s1, b1 = _fold_bn(p["b1"], p["g1"], p["beta1"], p["m1"], p["v1"])
    s2, b2 = _fold_bn(p["b2"], p["g2"], p["beta2"], p["m2"], p["v2"])

    # torch conv weight (Cout, Cin, 3, 3) -> im2col layout (9*Cin, Cout),
    # rows ordered (tap, cin) to match the in-kernel patch layout; BN scale
    # folded into the weight columns (done once, outside the hot loop).
    w1k = jnp.transpose(p["w1"], (2, 3, 1, 0)).reshape(9 * Cin, Cout) * s1[None, :]
    w2k = jnp.transpose(p["w2"], (2, 3, 1, 0)).reshape(9 * Cout, Cout) * s2[None, :]

    # TODO(synk): at production sizes (e.g. 128x128 spatial, 256 channels) add
    #             a grid axis tiling Ho in row blocks with a 1-row halo and set
    #             vmem_limit_bytes explicitly (v7x has only 64 MiB VMEM and 2
    #             TensorCores); whole-image-per-step blocks are fine here.
    kernel = make_down_kernel(Ho, Wo, Cin, Cout)
    out = pl.pallas_call(
        kernel,
        out_shape=jax.ShapeDtypeStruct((N, Ho * Wo, Cout), jnp.float32),
        grid=(N,),
        in_specs=[
            # NHWC input, batch dim squeezed; no HBM relayout in the wrapper.
            pl.BlockSpec((None, H, W, Cin), lambda n: (n, 0, 0, 0)),
            pl.BlockSpec((9 * Cin, Cout), lambda n: (0, 0)),
            pl.BlockSpec((1, Cout), lambda n: (0, 0)),
            pl.BlockSpec((9 * Cout, Cout), lambda n: (0, 0)),
            pl.BlockSpec((1, Cout), lambda n: (0, 0)),
        ],
        # NOTE: with Cout <= 16 the store is inherently lane-sparse; padding
        # Cout to 128 would cost 8-16x extra stores at these toy shapes, so we
        # keep the natural (Ho*Wo, Cout) layout (a lane-dense output slab only
        # pays off at production channel counts).
        out_specs=pl.BlockSpec((None, Ho * Wo, Cout), lambda n: (n, 0, 0)),
        scratch_shapes=[
            pltpu.VMEM((Ho + 2, Wo + 2, Cin), jnp.float32),   # padded conv1 in
            pltpu.VMEM((Ho, Wo, 9 * Cin), jnp.float32),       # conv1 im2col
            pltpu.VMEM((Ho + 2, Wo + 2, Cout), jnp.float32),  # padded conv2 in
            pltpu.VMEM((Ho, Wo, 9 * Cout), jnp.float32),      # conv2 im2col
        ],
        compiler_params=pltpu.CompilerParams(
            dimension_semantics=("parallel",)),
    )(x_nhwc, w1k, b1.reshape(1, Cout), w2k, b2.reshape(1, Cout))
    # Contiguous (free) reshape back to NHWC.
    return out.reshape(N, Ho, Wo, Cout)


# ----------------------------------------------------------------------------
# UNet_Encoder forward (NCHW in / list of NCHW out, matching the torch module)
# ----------------------------------------------------------------------------
def unet_encoder_forward(x_nchw, params, unsq=False):
    feats = [x_nchw]
    x = jnp.transpose(x_nchw, (0, 2, 3, 1))  # NCHW -> NHWC for the kernels
    for p in params:
        x = pallas_down(x, p)
        feats.append(jnp.transpose(x, (0, 3, 1, 2)))  # back to NCHW
    feats = feats[::-1]
    if unsq:
        feats = [jnp.expand_dims(f, 2) for f in feats]
    return feats


# ----------------------------------------------------------------------------
# Deterministic parameter init (shapes follow the torch module __init__)
# ----------------------------------------------------------------------------
def init_layer_params(key, cin, cout):
    ks = jax.random.split(key, 12)
    f32 = jnp.float32
    return {
        "w1": 0.1 * jax.random.normal(ks[0], (cout, cin, 3, 3), f32),
        "b1": 0.1 * jax.random.normal(ks[1], (cout,), f32),
        "g1": 1.0 + 0.1 * jax.random.normal(ks[2], (cout,), f32),
        "beta1": 0.1 * jax.random.normal(ks[3], (cout,), f32),
        "m1": 0.1 * jax.random.normal(ks[4], (cout,), f32),
        "v1": 0.5 + jnp.abs(0.2 * jax.random.normal(ks[5], (cout,), f32)),
        "w2": 0.1 * jax.random.normal(ks[6], (cout, cout, 3, 3), f32),
        "b2": 0.1 * jax.random.normal(ks[7], (cout,), f32),
        "g2": 1.0 + 0.1 * jax.random.normal(ks[8], (cout,), f32),
        "beta2": 0.1 * jax.random.normal(ks[9], (cout,), f32),
        "m2": 0.1 * jax.random.normal(ks[10], (cout,), f32),
        "v2": 0.5 + jnp.abs(0.2 * jax.random.normal(ks[11], (cout,), f32)),
    }


def init_encoder_params(key, topology):
    params = []
    n = len(topology)
    for idx in range(n):
        key, sub = jax.random.split(key)
        in_dim = topology[idx]
        out_dim = topology[idx + 1] if idx != n - 1 else topology[idx]
        params.append(init_layer_params(sub, in_dim, out_dim))
    return params


# ----------------------------------------------------------------------------
# Pure-JAX reference (for correctness check only)
# ----------------------------------------------------------------------------
def _ref_conv_bn_relu(x, w, b, g, beta, mean, var):
    w_hwio = jnp.transpose(w, (2, 3, 1, 0))
    y = jax.lax.conv_general_dilated(
        x, w_hwio, (1, 1), "SAME",
        dimension_numbers=("NHWC", "HWIO", "NHWC"),
        precision=jax.lax.Precision.HIGHEST) + b
    y = (y - mean) / jnp.sqrt(var + EPS) * g + beta
    return jnp.maximum(y, 0.0)


def _ref_down(x, p):
    N, H, W, C = x.shape
    xp = x.reshape(N, H // 2, 2, W // 2, 2, C).max(axis=(2, 4))
    y = _ref_conv_bn_relu(xp, p["w1"], p["b1"], p["g1"], p["beta1"], p["m1"], p["v1"])
    y = _ref_conv_bn_relu(y, p["w2"], p["b2"], p["g2"], p["beta2"], p["m2"], p["v2"])
    return y


def ref_forward(x_nchw, params):
    feats = [x_nchw]
    x = jnp.transpose(x_nchw, (0, 2, 3, 1))
    for p in params:
        x = _ref_down(x, p)
        feats.append(jnp.transpose(x, (0, 3, 1, 2)))
    return feats[::-1]


# ----------------------------------------------------------------------------
if __name__ == "__main__":
    topology = (4, 8, 16)
    key = jax.random.PRNGKey(0)
    key, kx = jax.random.split(key)
    x = jax.random.normal(kx, (2, 4, 16, 16), jnp.float32)  # NCHW

    params = init_encoder_params(key, topology)

    feats = unet_encoder_forward(x, params, unsq=False)
    feats = jax.block_until_ready(feats)

    # Correctness check against a pure-JAX reference (tightened tolerance:
    # the whole pipeline is f32, so 1e-3 catches real regressions).
    ref = ref_forward(x, params)
    for f, r in zip(feats, ref):
        assert f.shape == r.shape, (f.shape, r.shape)
        err = float(jnp.max(jnp.abs(f - r)))
        assert bool(jnp.allclose(f, r, rtol=1e-3, atol=1e-3)), err

    print("KERNEL_OK")
</pallas_src>

<mosaic_0001>
module attributes {stable_mosaic.version = 11 : i64} {
  func.func @kernel(%arg0: i32, %arg1: memref<1x16x16x4xf32, #tpu.memory_space<vmem>>, %arg2: memref<36x8xf32, #tpu.memory_space<vmem>>, %arg3: memref<1x8xf32, #tpu.memory_space<vmem>>, %arg4: memref<72x8xf32, #tpu.memory_space<vmem>>, %arg5: memref<1x8xf32, #tpu.memory_space<vmem>>, %arg6: memref<1x64x8xf32, #tpu.memory_space<vmem>>, %arg7: memref<10x10x4xf32, #tpu.memory_space<vmem>>, %arg8: memref<8x8x36xf32, #tpu.memory_space<vmem>>, %arg9: memref<10x10x8xf32, #tpu.memory_space<vmem>>, %arg10: memref<8x8x72xf32, #tpu.memory_space<vmem>>) attributes {dimension_semantics = [#tpu.dimension_semantics<parallel>], iteration_bounds = array<i64: 2>, scalar_prefetch = 0 : i64, scratch_operands = 4 : i64, tpu.core_type = #tpu.core_type<tc>, window_params = [{transform_indices = @transform_0, window_bounds = array<i64: 1, 16, 16, 4>}, {pipeline_mode = #tpu.pipeline_mode<synchronous>, transform_indices = @transform_1, window_bounds = array<i64: 36, 8>}, {pipeline_mode = #tpu.pipeline_mode<synchronous>, transform_indices = @transform_2, window_bounds = array<i64: 1, 8>}, {pipeline_mode = #tpu.pipeline_mode<synchronous>, transform_indices = @transform_3, window_bounds = array<i64: 72, 8>}, {pipeline_mode = #tpu.pipeline_mode<synchronous>, transform_indices = @transform_4, window_bounds = array<i64: 1, 8>}, {transform_indices = @transform_5, window_bounds = array<i64: 1, 64, 8>}]} {
    %c0 = arith.constant 0 : index
    %c0_0 = arith.constant 0 : index
    %c0_1 = arith.constant 0 : index
    %c0_2 = arith.constant 0 : index
    %0 = tpu.strided_load %arg1[%c0, %c0_0, %c0_1, %c0_2] {strides = array<i32: 1, 2, 2, 1>} : memref<1x16x16x4xf32, #tpu.memory_space<vmem>>, vector<1x8x8x4xf32>
    %1 = vector.shape_cast %0 : vector<1x8x8x4xf32> to vector<8x8x4xf32>
    %c0_3 = arith.constant 0 : index
    %c0_4 = arith.constant 0 : index
    %c1 = arith.constant 1 : index
    %c0_5 = arith.constant 0 : index
    %2 = tpu.strided_load %arg1[%c0_3, %c0_4, %c1, %c0_5] {strides = array<i32: 1, 2, 2, 1>} : memref<1x16x16x4xf32, #tpu.memory_space<vmem>>, vector<1x8x8x4xf32>
    %3 = vector.shape_cast %2 : vector<1x8x8x4xf32> to vector<8x8x4xf32>
    %c0_6 = arith.constant 0 : index
    %c1_7 = arith.constant 1 : index
    %c0_8 = arith.constant 0 : index
    %c0_9 = arith.constant 0 : index
    %4 = tpu.strided_load %arg1[%c0_6, %c1_7, %c0_8, %c0_9] {strides = array<i32: 1, 2, 2, 1>} : memref<1x16x16x4xf32, #tpu.memory_space<vmem>>, vector<1x8x8x4xf32>
    %5 = vector.shape_cast %4 : vector<1x8x8x4xf32> to vector<8x8x4xf32>
    %c0_10 = arith.constant 0 : index
    %c1_11 = arith.constant 1 : index
    %c1_12 = arith.constant 1 : index
    %c0_13 = arith.constant 0 : index
    %6 = tpu.strided_load %arg1[%c0_10, %c1_11, %c1_12, %c0_13] {strides = array<i32: 1, 2, 2, 1>} : memref<1x16x16x4xf32, #tpu.memory_space<vmem>>, vector<1x8x8x4xf32>
    %7 = vector.shape_cast %6 : vector<1x8x8x4xf32> to vector<8x8x4xf32>
    %8 = arith.maximumf %1, %3 : vector<8x8x4xf32>
    %9 = arith.maximumf %5, %7 : vector<8x8x4xf32>
    %10 = arith.maximumf %8, %9 : vector<8x8x4xf32>
    %cst = arith.constant 0.000000e+00 : f32
    %11 = vector.broadcast %cst : f32 to vector<1x10x4xf32>
    %c0_14 = arith.constant 0 : index
    %c0_15 = arith.constant 0 : index
    %c0_16 = arith.constant 0 : index
    %12 = vector.load %arg7[%c0_14, %c0_15, %c0_16] : memref<10x10x4xf32, #tpu.memory_space<vmem>>, vector<1x10x4xf32>
    tpu.vector_store %arg7[%c0_14, %c0_15, %c0_16], %11 {strides = array<i32>} : memref<10x10x4xf32, #tpu.memory_space<vmem>>, vector<1x10x4xf32>,
    %c9 = arith.constant 9 : index
    %c0_17 = arith.constant 0 : index
    %c0_18 = arith.constant 0 : index
    %13 = vector.load %arg7[%c9, %c0_17, %c0_18] : memref<10x10x4xf32, #tpu.memory_space<vmem>>, vector<1x10x4xf32>
    tpu.vector_store %arg7[%c9, %c0_17, %c0_18], %11 {strides = array<i32>} : memref<10x10x4xf32, #tpu.memory_space<vmem>>, vector<1x10x4xf32>,
    %cst_19 = arith.constant 0.000000e+00 : f32
    %14 = vector.broadcast %cst_19 : f32 to vector<10x1x4xf32>
    %c0_20 = arith.constant 0 : index
    %c0_21 = arith.constant 0 : index
    %c0_22 = arith.constant 0 : index
    %15 = vector.load %arg7[%c0_20, %c0_21, %c0_22] : memref<10x10x4xf32, #tpu.memory_space<vmem>>, vector<10x1x4xf32>
    tpu.vector_store %arg7[%c0_20, %c0_21, %c0_22], %14 {strides = array<i32>} : memref<10x10x4xf32, #tpu.memory_space<vmem>>, vector<10x1x4xf32>,
    %c0_23 = arith.constant 0 : index
    %c9_24 = arith.constant 9 : index
    %c0_25 = arith.constant 0 : index
    %16 = vector.load %arg7[%c0_23, %c9_24, %c0_25] : memref<10x10x4xf32, #tpu.memory_space<vmem>>, vector<10x1x4xf32>
    tpu.vector_store %arg7[%c0_23, %c9_24, %c0_25], %14 {strides = array<i32>} : memref<10x10x4xf32, #tpu.memory_space<vmem>>, vector<10x1x4xf32>,
    %c1_26 = arith.constant 1 : index
    %c1_27 = arith.constant 1 : index
    %c0_28 = arith.constant 0 : index
    %17 = vector.load %arg7[%c1_26, %c1_27, %c0_28] : memref<10x10x4xf32, #tpu.memory_space<vmem>>, vector<8x8x4xf32>
    tpu.vector_store %arg7[%c1_26, %c1_27, %c0_28], %10 {strides = array<i32>} : memref<10x10x4xf32, #tpu.memory_space<vmem>>, vector<8x8x4xf32>,
    %c0_29 = arith.constant 0 : index
    %c0_30 = arith.constant 0 : index
    %c0_31 = arith.constant 0 : index
    %18 = vector.load %arg7[%c0_29, %c0_30, %c0_31] : memref<10x10x4xf32, #tpu.memory_space<vmem>>, vector<8x8x4xf32>
    %c0_32 = arith.constant 0 : index
    %c0_33 = arith.constant 0 : index
    %c0_34 = arith.constant 0 : index
    %19 = vector.load %arg8[%c0_32, %c0_33, %c0_34] : memref<8x8x36xf32, #tpu.memory_space<vmem>>, vector<8x8x4xf32>
    tpu.vector_store %arg8[%c0_32, %c0_33, %c0_34], %18 {strides = array<i32>} : memref<8x8x36xf32, #tpu.memory_space<vmem>>, vector<8x8x4xf32>,
    %c0_35 = arith.constant 0 : index
    %c1_36 = arith.constant 1 : index
    %c0_37 = arith.constant 0 : index
    %20 = vector.load %arg7[%c0_35, %c1_36, %c0_37] : memref<10x10x4xf32, #tpu.memory_space<vmem>>, vector<8x8x4xf32>
    %c0_38 = arith.constant 0 : index
    %c0_39 = arith.constant 0 : index
    %c4 = arith.constant 4 : index
    %21 = vector.load %arg8[%c0_38, %c0_39, %c4] : memref<8x8x36xf32, #tpu.memory_space<vmem>>, vector<8x8x4xf32>
    tpu.vector_store %arg8[%c0_38, %c0_39, %c4], %20 {strides = array<i32>} : memref<8x8x36xf32, #tpu.memory_space<vmem>>, vector<8x8x4xf32>,
    %c0_40 = arith.constant 0 : index
    %c2 = arith.constant 2 : index
    %c0_41 = arith.constant 0 : index
    %22 = vector.load %arg7[%c0_40, %c2, %c0_41] : memref<10x10x4xf32, #tpu.memory_space<vmem>>, vector<8x8x4xf32>
    %c0_42 = arith.constant 0 : index
    %c0_43 = arith.constant 0 : index
    %c8 = arith.constant 8 : index
    %23 = vector.load %arg8[%c0_42, %c0_43, %c8] : memref<8x8x36xf32, #tpu.memory_space<vmem>>, vector<8x8x4xf32>
    tpu.vector_store %arg8[%c0_42, %c0_43, %c8], %22 {strides = array<i32>} : memref<8x8x36xf32, #tpu.memory_space<vmem>>, vector<8x8x4xf32>,
    %c1_44 = arith.constant 1 : index
    %c0_45 = arith.constant 0 : index
    %c0_46 = arith.constant 0 : index
    %24 = vector.load %arg7[%c1_44, %c0_45, %c0_46] : memref<10x10x4xf32, #tpu.memory_space<vmem>>, vector<8x8x4xf32>
    %c0_47 = arith.constant 0 : index
    %c0_48 = arith.constant 0 : index
    %c12 = arith.constant 12 : index
    %25 = vector.load %arg8[%c0_47, %c0_48, %c12] : memref<8x8x36xf32, #tpu.memory_space<vmem>>, vector<8x8x4xf32>
    tpu.vector_store %arg8[%c0_47, %c0_48, %c12], %24 {strides = array<i32>} : memref<8x8x36xf32, #tpu.memory_space<vmem>>, vector<8x8x4xf32>,
    %c1_49 = arith.constant 1 : index
    %c1_50 = arith.constant 1 : index
    %c0_51 = arith.constant 0 : index
    %26 = vector.load %arg7[%c1_49, %c1_50, %c0_51] : memref<10x10x4xf32, #tpu.memory_space<vmem>>, vector<8x8x4xf32>
    %c0_52 = arith.constant 0 : index
    %c0_53 = arith.constant 0 : index
    %c16 = arith.constant 16 : index
    %27 = vector.load %arg8[%c0_52, %c0_53, %c16] : memref<8x8x36xf32, #tpu.memory_space<vmem>>, vector<8x8x4xf32>
    tpu.vector_store %arg8[%c0_52, %c0_53, %c16], %26 {strides = array<i32>} : memref<8x8x36xf32, #tpu.memory_space<vmem>>, vector<8x8x4xf32>,
    %c1_54 = arith.constant 1 : index
    %c2_55 = arith.constant 2 : index
    %c0_56 = arith.constant 0 : index
    %28 = vector.load %arg7[%c1_54, %c2_55, %c0_56] : memref<10x10x4xf32, #tpu.memory_space<vmem>>, vector<8x8x4xf32>
    %c0_57 = arith.constant 0 : index
    %c0_58 = arith.constant 0 : index
    %c20 = arith.constant 20 : index
    %29 = vector.load %arg8[%c0_57, %c0_58, %c20] : memref<8x8x36xf32, #tpu.memory_space<vmem>>, vector<8x8x4xf32>
    tpu.vector_store %arg8[%c0_57, %c0_58, %c20], %28 {strides = array<i32>} : memref<8x8x36xf32, #tpu.memory_space<vmem>>, vector<8x8x4xf32>,
    %c2_59 = arith.constant 2 : index
    %c0_60 = arith.constant 0 : index
    %c0_61 = arith.constant 0 : index
    %30 = vector.load %arg7[%c2_59, %c0_60, %c0_61] : memref<10x10x4xf32, #tpu.memory_space<vmem>>, vector<8x8x4xf32>
    %c0_62 = arith.constant 0 : index
    %c0_63 = arith.constant 0 : index
    %c24 = arith.constant 24 : index
    %31 = vector.load %arg8[%c0_62, %c0_63, %c24] : memref<8x8x36xf32, #tpu.memory_space<vmem>>, vector<8x8x4xf32>
    tpu.vector_store %arg8[%c0_62, %c0_63, %c24], %30 {strides = array<i32>} : memref<8x8x36xf32, #tpu.memory_space<vmem>>, vector<8x8x4xf32>,
    %c2_64 = arith.constant 2 : index
    %c1_65 = arith.constant 1 : index
    %c0_66 = arith.constant 0 : index
    %32 = vector.load %arg7[%c2_64, %c1_65, %c0_66] : memref<10x10x4xf32, #tpu.memory_space<vmem>>, vector<8x8x4xf32>
    %c0_67 = arith.constant 0 : index
    %c0_68 = arith.constant 0 : index
    %c28 = arith.constant 28 : index
    %33 = vector.load %arg8[%c0_67, %c0_68, %c28] : memref<8x8x36xf32, #tpu.memory_space<vmem>>, vector<8x8x4xf32>
    tpu.vector_store %arg8[%c0_67, %c0_68, %c28], %32 {strides = array<i32>} : memref<8x8x36xf32, #tpu.memory_space<vmem>>, vector<8x8x4xf32>,
    %c2_69 = arith.constant 2 : index
    %c2_70 = arith.constant 2 : index
    %c0_71 = arith.constant 0 : index
    %34 = vector.load %arg7[%c2_69, %c2_70, %c0_71] : memref<10x10x4xf32, #tpu.memory_space<vmem>>, vector<8x8x4xf32>
    %c0_72 = arith.constant 0 : index
    %c0_73 = arith.constant 0 : index
    %c32 = arith.constant 32 : index
    %35 = vector.load %arg8[%c0_72, %c0_73, %c32] : memref<8x8x36xf32, #tpu.memory_space<vmem>>, vector<8x8x4xf32>
    tpu.vector_store %arg8[%c0_72, %c0_73, %c32], %34 {strides = array<i32>} : memref<8x8x36xf32, #tpu.memory_space<vmem>>, vector<8x8x4xf32>,
    %c0_74 = arith.constant 0 : index
    %c0_75 = arith.constant 0 : index
    %c0_76 = arith.constant 0 : index
    %36 = vector.load %arg8[%c0_74, %c0_75, %c0_76] : memref<8x8x36xf32, #tpu.memory_space<vmem>>, vector<8x8x36xf32>
    %37 = vector.shape_cast %36 : vector<8x8x36xf32> to vector<64x36xf32>
    %c0_77 = arith.constant 0 : index
    %c0_78 = arith.constant 0 : index
    %38 = vector.load %arg2[%c0_77, %c0_78] : memref<36x8xf32, #tpu.memory_space<vmem>>, vector<36x8xf32>
    %cst_79 = arith.constant dense<0.000000e+00> : vector<64x8xf32>
    %39 = tpu.matmul %37, %38, %cst_79 {dimension_numbers = #tpu.dot_dimension_numbers<[1], [0], [0], [1], [0, 0, 1, 1], [], []>} : vector<64x36xf32>, vector<36x8xf32>, vector<64x8xf32> -> vector<64x8xf32>
    %c0_80 = arith.constant 0 : index
    %c0_81 = arith.constant 0 : index
    %40 = vector.load %arg3[%c0_80, %c0_81] : memref<1x8xf32, #tpu.memory_space<vmem>>, vector<1x8xf32>
    %41 = vector.broadcast %40 : vector<1x8xf32> to vector<64x8xf32>
    %42 = arith.addf %39, %41 : vector<64x8xf32>
    %cst_82 = arith.constant 0.000000e+00 : f32
    %43 = vector.broadcast %cst_82 : f32 to vector<64x8xf32>
    %44 = arith.maximumf %42, %43 : vector<64x8xf32>
    %cst_83 = arith.constant 0.000000e+00 : f32
    %45 = vector.broadcast %cst_83 : f32 to vector<1x10x8xf32>
    %c0_84 = arith.constant 0 : index
    %c0_85 = arith.constant 0 : index
    %c0_86 = arith.constant 0 : index
    %46 = vector.load %arg9[%c0_84, %c0_85, %c0_86] : memref<10x10x8xf32, #tpu.memory_space<vmem>>, vector<1x10x8xf32>
    tpu.vector_store %arg9[%c0_84, %c0_85, %c0_86], %45 {strides = array<i32>} : memref<10x10x8xf32, #tpu.memory_space<vmem>>, vector<1x10x8xf32>,
    %c9_87 = arith.constant 9 : index
    %c0_88 = arith.constant 0 : index
    %c0_89 = arith.constant 0 : index
    %47 = vector.load %arg9[%c9_87, %c0_88, %c0_89] : memref<10x10x8xf32, #tpu.memory_space<vmem>>, vector<1x10x8xf32>
    tpu.vector_store %arg9[%c9_87, %c0_88, %c0_89], %45 {strides = array<i32>} : memref<10x10x8xf32, #tpu.memory_space<vmem>>, vector<1x10x8xf32>,
    %cst_90 = arith.constant 0.000000e+00 : f32
    %48 = vector.broadcast %cst_90 : f32 to vector<10x1x8xf32>
    %c0_91 = arith.constant 0 : index
    %c0_92 = arith.constant 0 : index
    %c0_93 = arith.constant 0 : index
    %49 = vector.load %arg9[%c0_91, %c0_92, %c0_93] : memref<10x10x8xf32, #tpu.memory_space<vmem>>, vector<10x1x8xf32>
    tpu.vector_store %arg9[%c0_91, %c0_92, %c0_93], %48 {strides = array<i32>} : memref<10x10x8xf32, #tpu.memory_space<vmem>>, vector<10x1x8xf32>,
    %c0_94 = arith.constant 0 : index
    %c9_95 = arith.constant 9 : index
    %c0_96 = arith.constant 0 : index
    %50 = vector.load %arg9[%c0_94, %c9_95, %c0_96] : memref<10x10x8xf32, #tpu.memory_space<vmem>>, vector<10x1x8xf32>
    tpu.vector_store %arg9[%c0_94, %c9_95, %c0_96], %48 {strides = array<i32>} : memref<10x10x8xf32, #tpu.memory_space<vmem>>, vector<10x1x8xf32>,
    %51 = vector.shape_cast %44 : vector<64x8xf32> to vector<8x8x8xf32>
    %c1_97 = arith.constant 1 : index
    %c1_98 = arith.constant 1 : index
    %c0_99 = arith.constant 0 : index
    %52 = vector.load %arg9[%c1_97, %c1_98, %c0_99] : memref<10x10x8xf32, #tpu.memory_space<vmem>>, vector<8x8x8xf32>
    tpu.vector_store %arg9[%c1_97, %c1_98, %c0_99], %51 {strides = array<i32>} : memref<10x10x8xf32, #tpu.memory_space<vmem>>, vector<8x8x8xf32>,
    %c0_100 = arith.constant 0 : index
    %c0_101 = arith.constant 0 : index
    %c0_102 = arith.constant 0 : index
    %53 = vector.load %arg9[%c0_100, %c0_101, %c0_102] : memref<10x10x8xf32, #tpu.memory_space<vmem>>, vector<8x8x8xf32>
    %c0_103 = arith.constant 0 : index
    %c0_104 = arith.constant 0 : index
    %c0_105 = arith.constant 0 : index
    %54 = vector.load %arg10[%c0_103, %c0_104, %c0_105] : memref<8x8x72xf32, #tpu.memory_space<vmem>>, vector<8x8x8xf32>
    tpu.vector_store %arg10[%c0_103, %c0_104, %c0_105], %53 {strides = array<i32>} : memref<8x8x72xf32, #tpu.memory_space<vmem>>, vector<8x8x8xf32>,
    %c0_106 = arith.constant 0 : index
    %c1_107 = arith.constant 1 : index
    %c0_108 = arith.constant 0 : index
    %55 = vector.load %arg9[%c0_106, %c1_107, %c0_108] : memref<10x10x8xf32, #tpu.memory_space<vmem>>, vector<8x8x8xf32>
    %c0_109 = arith.constant 0 : index
    %c0_110 = arith.constant 0 : index
    %c8_111 = arith.constant 8 : index
    %56 = vector.load %arg10[%c0_109, %c0_110, %c8_111] : memref<8x8x72xf32, #tpu.memory_space<vmem>>, vector<8x8x8xf32>
    tpu.vector_store %arg10[%c0_109, %c0_110, %c8_111], %55 {strides = array<i32>} : memref<8x8x72xf32, #tpu.memory_space<vmem>>, vector<8x8x8xf32>,
    %c0_112 = arith.constant 0 : index
    %c2_113 = arith.constant 2 : index
    %c0_114 = arith.constant 0 : index
    %57 = vector.load %arg9[%c0_112, %c2_113, %c0_114] : memref<10x10x8xf32, #tpu.memory_space<vmem>>, vector<8x8x8xf32>
    %c0_115 = arith.constant 0 : index
    %c0_116 = arith.constant 0 : index
    %c16_117 = arith.constant 16 : index
    %58 = vector.load %arg10[%c0_115, %c0_116, %c16_117] : memref<8x8x72xf32, #tpu.memory_space<vmem>>, vector<8x8x8xf32>
    tpu.vector_store %arg10[%c0_115, %c0_116, %c16_117], %57 {strides = array<i32>} : memref<8x8x72xf32, #tpu.memory_space<vmem>>, vector<8x8x8xf32>,
    %c1_118 = arith.constant 1 : index
    %c0_119 = arith.constant 0 : index
    %c0_120 = arith.constant 0 : index
    %59 = vector.load %arg9[%c1_118, %c0_119, %c0_120] : memref<10x10x8xf32, #tpu.memory_space<vmem>>, vector<8x8x8xf32>
    %c0_121 = arith.constant 0 : index
    %c0_122 = arith.constant 0 : index
    %c24_123 = arith.constant 24 : index
    %60 = vector.load %arg10[%c0_121, %c0_122, %c24_123] : memref<8x8x72xf32, #tpu.memory_space<vmem>>, vector<8x8x8xf32>
    tpu.vector_store %arg10[%c0_121, %c0_122, %c24_123], %59 {strides = array<i32>} : memref<8x8x72xf32, #tpu.memory_space<vmem>>, vector<8x8x8xf32>,
    %c1_124 = arith.constant 1 : index
    %c1_125 = arith.constant 1 : index
    %c0_126 = arith.constant 0 : index
    %61 = vector.load %arg9[%c1_124, %c1_125, %c0_126] : memref<10x10x8xf32, #tpu.memory_space<vmem>>, vector<8x8x8xf32>
    %c0_127 = arith.constant 0 : index
    %c0_128 = arith.constant 0 : index
    %c32_129 = arith.constant 32 : index
    %62 = vector.load %arg10[%c0_127, %c0_128, %c32_129] : memref<8x8x72xf32, #tpu.memory_space<vmem>>, vector<8x8x8xf32>
    tpu.vector_store %arg10[%c0_127, %c0_128, %c32_129], %61 {strides = array<i32>} : memref<8x8x72xf32, #tpu.memory_space<vmem>>, vector<8x8x8xf32>,
    %c1_130 = arith.constant 1 : index
    %c2_131 = arith.constant 2 : index
    %c0_132 = arith.constant 0 : index
    %63 = vector.load %arg9[%c1_130, %c2_131, %c0_132] : memref<10x10x8xf32, #tpu.memory_space<vmem>>, vector<8x8x8xf32>
    %c0_133 = arith.constant 0 : index
    %c0_134 = arith.constant 0 : index
    %c40 = arith.constant 40 : index
    %64 = vector.load %arg10[%c0_133, %c0_134, %c40] : memref<8x8x72xf32, #tpu.memory_space<vmem>>, vector<8x8x8xf32>
    tpu.vector_store %arg10[%c0_133, %c0_134, %c40], %63 {strides = array<i32>} : memref<8x8x72xf32, #tpu.memory_space<vmem>>, vector<8x8x8xf32>,
    %c2_135 = arith.constant 2 : index
    %c0_136 = arith.constant 0 : index
    %c0_137 = arith.constant 0 : index
    %65 = vector.load %arg9[%c2_135, %c0_136, %c0_137] : memref<10x10x8xf32, #tpu.memory_space<vmem>>, vector<8x8x8xf32>
    %c0_138 = arith.constant 0 : index
    %c0_139 = arith.constant 0 : index
    %c48 = arith.constant 48 : index
    %66 = vector.load %arg10[%c0_138, %c0_139, %c48] : memref<8x8x72xf32, #tpu.memory_space<vmem>>, vector<8x8x8xf32>
    tpu.vector_store %arg10[%c0_138, %c0_139, %c48], %65 {strides = array<i32>} : memref<8x8x72xf32, #tpu.memory_space<vmem>>, vector<8x8x8xf32>,
    %c2_140 = arith.constant 2 : index
    %c1_141 = arith.constant 1 : index
    %c0_142 = arith.constant 0 : index
    %67 = vector.load %arg9[%c2_140, %c1_141, %c0_142] : memref<10x10x8xf32, #tpu.memory_space<vmem>>, vector<8x8x8xf32>
    %c0_143 = arith.constant 0 : index
    %c0_144 = arith.constant 0 : index
    %c56 = arith.constant 56 : index
    %68 = vector.load %arg10[%c0_143, %c0_144, %c56] : memref<8x8x72xf32, #tpu.memory_space<vmem>>, vector<8x8x8xf32>
    tpu.vector_store %arg10[%c0_143, %c0_144, %c56], %67 {strides = array<i32>} : memref<8x8x72xf32, #tpu.memory_space<vmem>>, vector<8x8x8xf32>,
    %c2_145 = arith.constant 2 : index
    %c2_146 = arith.constant 2 : index
    %c0_147 = arith.constant 0 : index
    %69 = vector.load %arg9[%c2_145, %c2_146, %c0_147] : memref<10x10x8xf32, #tpu.memory_space<vmem>>, vector<8x8x8xf32>
    %c0_148 = arith.constant 0 : index
    %c0_149 = arith.constant 0 : index
    %c64 = arith.constant 64 : index
    %70 = vector.load %arg10[%c0_148, %c0_149, %c64] : memref<8x8x72xf32, #tpu.memory_space<vmem>>, vector<8x8x8xf32>
    tpu.vector_store %arg10[%c0_148, %c0_149, %c64], %69 {strides = array<i32>} : memref<8x8x72xf32, #tpu.memory_space<vmem>>, vector<8x8x8xf32>,
    %c0_150 = arith.constant 0 : index
    %c0_151 = arith.constant 0 : index
    %c0_152 = arith.constant 0 : index
    %71 = vector.load %arg10[%c0_150, %c0_151, %c0_152] : memref<8x8x72xf32, #tpu.memory_space<vmem>>, vector<8x8x72xf32>
    %72 = vector.shape_cast %71 : vector<8x8x72xf32> to vector<64x72xf32>
    %c0_153 = arith.constant 0 : index
    %c0_154 = arith.constant 0 : index
    %73 = vector.load %arg4[%c0_153, %c0_154] : memref<72x8xf32, #tpu.memory_space<vmem>>, vector<72x8xf32>
    %cst_155 = arith.constant dense<0.000000e+00> : vector<64x8xf32>
    %74 = tpu.matmul %72, %73, %cst_155 {dimension_numbers = #tpu.dot_dimension_numbers<[1], [0], [0], [1], [0, 0, 1, 1], [], []>} : vector<64x72xf32>, vector<72x8xf32>, vector<64x8xf32> -> vector<64x8xf32>
    %c0_156 = arith.constant 0 : index
    %c0_157 = arith.constant 0 : index
    %75 = vector.load %arg5[%c0_156, %c0_157] : memref<1x8xf32, #tpu.memory_space<vmem>>, vector<1x8xf32>
    %76 = vector.broadcast %75 : vector<1x8xf32> to vector<64x8xf32>
    %77 = arith.addf %74, %76 : vector<64x8xf32>
    %cst_158 = arith.constant 0.000000e+00 : f32
    %78 = vector.broadcast %cst_158 : f32 to vector<64x8xf32>
    %79 = arith.maximumf %77, %78 : vector<64x8xf32>
    %c0_159 = arith.constant 0 : index
    %c0_160 = arith.constant 0 : index
    %c0_161 = arith.constant 0 : index
    %80 = vector.load %arg6[%c0_159, %c0_160, %c0_161] : memref<1x64x8xf32, #tpu.memory_space<vmem>>, vector<1x64x8xf32>
    %81 = vector.shape_cast %80 : vector<1x64x8xf32> to vector<64x8xf32>
    %82 = vector.shape_cast %79 : vector<64x8xf32> to vector<1x64x8xf32>
    tpu.vector_store %arg6[%c0_159, %c0_160, %c0_161], %82 {strides = array<i32>} : memref<1x64x8xf32, #tpu.memory_space<vmem>>, vector<1x64x8xf32>,
    return
  }
  func.func @transform_0(%arg0: i32) -> (i32, i32, i32, i32) {
    %c0_i32 = arith.constant 0 : i32
    %c0_i32_0 = arith.constant 0 : i32
    %c0_i32_1 = arith.constant 0 : i32
    %c0_i32_2 = arith.constant 0 : i32
    return %arg0, %c0_i32, %c0_i32_0, %c0_i32_1 : i32, i32, i32, i32
  }
  func.func @transform_1(%arg0: i32) -> (i32, i32) {
    %c0_i32 = arith.constant 0 : i32
    %c0_i32_0 = arith.constant 0 : i32
    %c0_i32_1 = arith.constant 0 : i32
    return %c0_i32, %c0_i32_0 : i32, i32
  }
  func.func @transform_2(%arg0: i32) -> (i32, i32) {
    %c0_i32 = arith.constant 0 : i32
    %c0_i32_0 = arith.constant 0 : i32
    %c0_i32_1 = arith.constant 0 : i32
    return %c0_i32, %c0_i32_0 : i32, i32
  }
  func.func @transform_3(%arg0: i32) -> (i32, i32) {
    %c0_i32 = arith.constant 0 : i32
    %c0_i32_0 = arith.constant 0 : i32
    %c0_i32_1 = arith.constant 0 : i32
    return %c0_i32, %c0_i32_0 : i32, i32
  }
  func.func @transform_4(%arg0: i32) -> (i32, i32) {
    %c0_i32 = arith.constant 0 : i32
    %c0_i32_0 = arith.constant 0 : i32
    %c0_i32_1 = arith.constant 0 : i32
    return %c0_i32, %c0_i32_0 : i32, i32
  }
  func.func @transform_5(%arg0: i32) -> (i32, i32, i32) {
    %c0_i32 = arith.constant 0 : i32
    %c0_i32_0 = arith.constant 0 : i32
    %c0_i32_1 = arith.constant 0 : i32
    return %arg0, %c0_i32, %c0_i32_0 : i32, i32, i32
  }
}

</mosaic_0001>

<bundles_post_ra>
// kernel: tpu_custom_call.1
= control target key start
LH: loop header
LB: loop body
LE: loop exit
PB: predicated region body
PF: predicated region fallthrough
CT: control target
= control target key end

     0   :  { %s1823_s18 = smov 0   ;;  %s2362_s0 = inlined_call_operand.vmem [shape: f32[2,16,16,4], index: 0, kind: input, shape index: {}]   ;;  %s2363_s1 = inlined_call_operand.vmem [shape: f32[36,8], index: 1, kind: input, shape index: {}]   ;;  %s2364_s2 = inlined_call_operand.vmem [shape: f32[1,8], index: 2, kind: input, shape index: {}]   ;;  %s2365_s3 = inlined_call_operand.vmem [shape: f32[72,8], index: 3, kind: input, shape index: {}]   ;;  %s2366_s4 = inlined_call_operand.vmem [shape: f32[1,8], index: 4, kind: input, shape index: {}]   ;;  %s2367_s5 = inlined_call_operand.vmem [shape: f32[2,64,8], index: 5, kind: output, shape index: {}]  }
   0x1 LB: > { %s1606_s19 = sadd.s32 4294967295, %s1778_s18   ;;  %p1610_p0 = scmp.ge.s32.totalorder %s1778_s18, 1  ;;  %s1778_s18 = sphi %s1823_s18, %s15_s18  }
   0x2   : > { %p187_p1 = scmp.lt.s32.totalorder %s1778_s18, 3 }
   0x4   : > { %p188_p2 = pnand %p1610_p0, %p187_p1 }
   0x5   : > { %p215_p3 = scmp.lt.s32.totalorder (!%p188_p2), %s1606_s19, 1  ;;  %s1781_s24 = smov (!%p188_p2), 4  }
   0x6   : > { %191 = sbr.rel (%p188_p2) target bundleno = 863 (0x35f), region = 40  ;;  %s1782_s25 = smov (!%p188_p2), 8  }
   0x7   : > { %s1783_s26 = smov (!%p188_p2), 12   ;;  %s1784_s27 = smov (!%p188_p2), 16  }
   0x8   : > { %s1785_s28 = smov (!%p188_p2), 20   ;;  %s1786_s29 = smov (!%p188_p2), 24  }
   0x9   : > { %s1787_s7 = smov (!%p188_p2), 28   ;;  %s1788_s14 = smov (!%p188_p2), 32  }
   0xa   : > { %s1789_s17 = smov (!%p188_p2), 48  }
   0xb   : > { %vm312_vm0 = vcmask 31744   ;;  %vm314_vm1 = vcmask 25600   ;;  %vm319_vm2 = vcmask 24576   ;;  %v1780_v0 = vmov 0.0   ;;  %s2369_s19 = smov (!%p215_p3, %s1606_s19), 1 }
   0xc   : > { %313 = vst.msk [vmem:[#allocation2] sm:$0xff] %vm312_vm0, %v1780_v0  ;;  %317 = vst.msk [vmem:[#allocation2 + $0x90] sm:$0xff] %vm312_vm0, %v1780_v0  ;;  %s1667_s20 = sshll.u32 %s2369_s19, 8  ;;  %vm803_vm3 = vcmask 1043456   ;;  %vm405_vm4 = vcmask 64544   ;;  %vm454_vm5 = vcmask 97344  }
   0xd   : > { %315 = vst.msk [vmem:[#allocation2 + $0x8] sm:$0x3] %vm314_vm1, %v1780_v0  ;;  %318 = vst.msk [vmem:[#allocation2 + $0x98] sm:$0x3] %vm314_vm1, %v1780_v0  ;;  %s1887_s23 = scalar_lea.vmem %s2362_s0, %s1667_s20  ;;  %vm503_vm6 = vcmask 130144   ;;  %vm552_vm7 = vcmask 162944  }
   0xe   : > { %321 = vst.msk [vmem:[#allocation2 + $0x10] sm:$0x1] %vm319_vm2, %v1780_v0  ;;  %322 = vst.msk [vmem:[#allocation2 + $0x20] sm:$0x1] %vm319_vm2, %v1780_v0  ;;  %v225_v1 = vld [vmem:[%s1887_s23] ss:$2 sm:$0xff] }
   0xf   : > { %323 = vst.msk [vmem:[#allocation2 + $0x30] sm:$0x1] %vm319_vm2, %v1780_v0  ;;  %324 = vst.msk [vmem:[#allocation2 + $0x40] sm:$0x1] %vm319_vm2, %v1780_v0  ;;  %v1622_v2 = vld [vmem:[%s1887_s23 + $0x1] ss:$2 sm:$0xff] }
  0x10   : > { %325 = vst.msk [vmem:[#allocation2 + $0x50] sm:$0x1] %vm319_vm2, %v1780_v0  ;;  %326 = vst.msk [vmem:[#allocation2 + $0x60] sm:$0x1] %vm319_vm2, %v1780_v0  ;;  %v1630_v3 = vld [vmem:[%s1887_s23 + $0x10] ss:$2 sm:$0xff]  ;;  %v288_v6 = vmax.f32 %v225_v1, %v1622_v2 }
  0x11   : > { %327 = vst.msk [vmem:[#allocation2 + $0x70] sm:$0x1] %vm319_vm2, %v1780_v0  ;;  %328 = vst.msk [vmem:[#allocation2 + $0x80] sm:$0x1] %vm319_vm2, %v1780_v0  ;;  %v1638_v5 = vld [vmem:[%s1887_s23 + $0x11] ss:$2 sm:$0xff] }
  0x12   : > { %331 = vst.msk [vmem:[#allocation2 + $0x19] sm:$0x1] %vm319_vm2, %v1780_v0  ;;  %332 = vst.msk [vmem:[#allocation2 + $0x29] sm:$0x1] %vm319_vm2, %v1780_v0  ;;  %v1615_v7 = vld [vmem:[%s1887_s23 + $0x20] ss:$2 sm:$0xff]  ;;  %v296_v9 = vmax.f32 %v1630_v3, %v1638_v5 }
  0x13   : > { %333 = vst.msk [vmem:[#allocation2 + $0x39] sm:$0x1] %vm319_vm2, %v1780_v0  ;;  %334 = vst.msk [vmem:[#allocation2 + $0x49] sm:$0x1] %vm319_vm2, %v1780_v0  ;;  %v1623_v10 = vld [vmem:[%s1887_s23 + $0x21] ss:$2 sm:$0xff] }
  0x14   : > { %335 = vst.msk [vmem:[#allocation2 + $0x59] sm:$0x1] %vm319_vm2, %v1780_v0  ;;  %336 = vst.msk [vmem:[#allocation2 + $0x69] sm:$0x1] %vm319_vm2, %v1780_v0  ;;  %v365_v4 = vld [vmem:[#allocation2 + $0x1] sm:$0xff]  ;;  %v289_v13 = vmax.f32 %v1615_v7, %v1623_v10  ;;  %v304_v16 = vmax.f32 %v288_v6, %v296_v9  ;;  %vm601_vm8 = vcmask 195744  }
  0x15   : > { %337 = vst.msk [vmem:[#allocation2 + $0x79] sm:$0x1] %vm319_vm2, %v1780_v0  ;;  %338 = vst.msk [vmem:[#allocation2 + $0x89] sm:$0x1] %vm319_vm2, %v1780_v0  ;;  %381 = vrot.lane.b32.xlu0 %v365_v4, %s1781_s24  ;;  %v1631_v11 = vld [vmem:[%s1887_s23 + $0x30] ss:$2 sm:$0xff] }
  0x16   : > { %320 = vst.msk [vmem:[#allocation2] sm:$0x1] %vm319_vm2, %v1780_v0  ;;  %330 = vst.msk [vmem:[#allocation2 + $0x9] sm:$0x1] %vm319_vm2, %v1780_v0  ;;  %v1639_v12 = vld [vmem:[%s1887_s23 + $0x31] ss:$2 sm:$0xff] }
  0x17   : > { %329 = vst.msk [vmem:[#allocation2 + $0x90] sm:$0x1] %vm319_vm2, %v1780_v0  ;;  %339 = vst.msk [vmem:[#allocation2 + $0x99] sm:$0x1] %vm319_vm2, %v1780_v0  ;;  %v1616_v14 = vld [vmem:[%s1887_s23 + $0x40] ss:$2 sm:$0xff]  ;;  %v297_v17 = vmax.f32 %v1631_v11, %v1639_v12 }
  0x18   : > { %v1624_v15 = vld [vmem:[%s1887_s23 + $0x41] ss:$2 sm:$0xff]  ;;  %v1632_v18 = vld [vmem:[%s1887_s23 + $0x50] ss:$2 sm:$0xff]  ;;  %v1640_v19 = vld [vmem:[%s1887_s23 + $0x51] ss:$2 sm:$0xff] }
  0x19   : > { %v290_v20 = vmax.f32 %v1616_v14, %v1624_v15  ;;  %v1617_v21 = vld [vmem:[%s1887_s23 + $0x60] ss:$2 sm:$0xff]  ;;  %v298_v22 = vmax.f32 %v1632_v18, %v1640_v19  ;;  %v1625_v23 = vld [vmem:[%s1887_s23 + $0x61] ss:$2 sm:$0xff]  ;;  %v1633_v24 = vld [vmem:[%s1887_s23 + $0x70] ss:$2 sm:$0xff]  ;;  %v305_v26 = vmax.f32 %v289_v13, %v297_v17 }
  0x1a   : > { %v1641_v25 = vld [vmem:[%s1887_s23 + $0x71] ss:$2 sm:$0xff]  ;;  %341 = vst.msk [vmem:[#allocation2 + $0x11] sm:$0xff] %vm312_vm0, %v304_v16  ;;  %v291_v27 = vmax.f32 %v1617_v21, %v1625_v23  ;;  %v1618_v29 = vld [vmem:[%s1887_s23 + $0x80] ss:$2 sm:$0xff]  ;;  %vm651_vm9 = vcmask 228544  }
  0x1b   : > { %v299_v28 = vmax.f32 %v1633_v24, %v1641_v25  ;;  %v1626_v30 = vld [vmem:[%s1887_s23 + $0x81] ss:$2 sm:$0xff]  ;;  %v1634_v31 = vld [vmem:[%s1887_s23 + $0x90] ss:$2 sm:$0xff]  ;;  %v306_v32 = vmax.f32 %v290_v20, %v298_v22  ;;  %v1642_v33 = vld [vmem:[%s1887_s23 + $0x91] ss:$2 sm:$0xff] }
  0x1c   : > { %v292_v34 = vmax.f32 %v1618_v29, %v1626_v30  ;;  %v1619_v35 = vld [vmem:[%s1887_s23 + $0xa0] ss:$2 sm:$0xff]  ;;  %v1627_v36 = vld [vmem:[%s1887_s23 + $0xa1] ss:$2 sm:$0xff]  ;;  %342 = vst.msk [vmem:[#allocation2 + $0x21] sm:$0xff] %vm312_vm0, %v305_v26  ;;  %v300_v38 = vmax.f32 %v1634_v31, %v1642_v33  ;;  %v769_v11 = vld [vmem:[%s2363_s1 + $0x18] sm:$0xff] }
  0x1d   : > { %v414_v8 = vld [vmem:[#allocation2 + $0x2] sm:$0xff]  ;;  %v307_v37 = vmax.f32 %v291_v27, %v299_v28  ;;  %v1635_v39 = vld [vmem:[%s1887_s23 + $0xb0] ss:$2 sm:$0xff]  ;;  %v1643_v40 = vld [vmem:[%s1887_s23 + $0xb1] ss:$2 sm:$0xff]  ;;  %v293_v41 = vmax.f32 %v1619_v35, %v1627_v36  ;;  %343 = vst.msk [vmem:[#allocation2 + $0x31] sm:$0xff] %vm312_vm0, %v306_v32 }
  0x1e   : > { %430 = vrot.lane.b32.xlu1 %v414_v8, %s1782_s25  ;;  %v1620_v42 = vld [vmem:[%s1887_s23 + $0xc0] ss:$2 sm:$0xff]  ;;  %v301_v43 = vmax.f32 %v1635_v39, %v1643_v40  ;;  %v1628_v44 = vld [vmem:[%s1887_s23 + $0xc1] ss:$2 sm:$0xff]  ;;  %v1636_v45 = vld [vmem:[%s1887_s23 + $0xd0] ss:$2 sm:$0xff]  ;;  %v308_v47 = vmax.f32 %v292_v34, %v300_v38 }
  0x1f   : > { %v1644_v46 = vld [vmem:[%s1887_s23 + $0xd1] ss:$2 sm:$0xff]  ;;  %344 = vst.msk [vmem:[#allocation2 + $0x41] sm:$0xff] %vm312_vm0, %v307_v37  ;;  %v294_v48 = vmax.f32 %v1620_v42, %v1628_v44  ;;  %v1621_v50 = vld [vmem:[%s1887_s23 + $0xe0] ss:$2 sm:$0xff]  ;;  %vm700_vm10 = vcmask 261344  }
  0x20   : > { %v302_v49 = vmax.f32 %v1636_v45, %v1644_v46  ;;  %v1629_v51 = vld [vmem:[%s1887_s23 + $0xe1] ss:$2 sm:$0xff]  ;;  %v1637_v52 = vld [vmem:[%s1887_s23 + $0xf0] ss:$2 sm:$0xff]  ;;  %v309_v53 = vmax.f32 %v293_v41, %v301_v43  ;;  %v1645_v54 = vld [vmem:[%s1887_s23 + $0xf1] ss:$2 sm:$0xff] }
  0x21   : > { %v295_v55 = vmax.f32 %v1621_v50, %v1629_v51  ;;  %v349_v56 = vld [vmem:[#allocation2] sm:$0xff]  ;;  %345 = vst.msk [vmem:[#allocation2 + $0x51] sm:$0xff] %vm312_vm0, %v308_v47  ;;  %v303_v58 = vmax.f32 %v1637_v52, %v1645_v54  ;;  %v415_v59 = vld [vmem:[#allocation2 + $0x12] sm:$0xff]  ;;  %v767_v13 = vld [vmem:[%s2363_s1 + $0x8] sm:$0xff]  ;;  %vm749_vm11 = vcmask 294144   ;;  %vm778_vm12 = vcmask 293888  }
  0x22   : > { %v310_v57 = vmax.f32 %v294_v48, %v302_v49  ;;  %357 = vst.msk [vmem:[#allocation3] sm:$0xff] %vm312_vm0, %v349_v56  ;;  %v366_v60 = vld [vmem:[#allocation2 + $0x11] sm:$0xff]  ;;  %346 = vst.msk [vmem:[#allocation2 + $0x61] sm:$0xff] %vm312_vm0, %v309_v53  ;;  %432 = vrot.lane.b32.xlu1 %v415_v59, %s1782_s25  ;;  %v770_v10 = vld [vmem:[%s2363_s1 + $0x20] sm:$0xf]  ;;  %vm920_vm13 = vcmask 64512  }
  0x23   : > { %v463_v61 = vld [vmem:[#allocation2 + $0x10] sm:$0xff]  ;;  %383 = vrot.lane.b32.xlu0 %v366_v60, %s1781_s24  ;;  %v311_v62 = vmax.f32 %v295_v55, %v303_v58  ;;  %v464_v63 = vld [vmem:[#allocation2 + $0x20] sm:$0xff]  ;;  %1699 = vmatprep.subr.msk.mxu0 %vm803_vm3, %v770_v10  ;;  %921 = vst.msk [vmem:[#allocation4] sm:$0xff] %vm920_vm13, %v1780_v0  ;;  %925 = vst.msk [vmem:[#allocation4 + $0x90] sm:$0xff] %vm920_vm13, %v1780_v0  ;;  %vm927_vm14 = vcmask 57344   ;;  %vm922_vm15 = vcmask 58368  }
  0x24   : > { %347 = vst.msk [vmem:[#allocation2 + $0x71] sm:$0xff] %vm312_vm0, %v310_v57  ;;  %358 = vst.msk [vmem:[#allocation3 + $0x8] sm:$0xff] %vm312_vm0, %v463_v61  ;;  %v465_v1 = vld [vmem:[#allocation2 + $0x30] sm:$0xff]  ;;  %v367_v3 = vld [vmem:[#allocation2 + $0x21] sm:$0xff]  ;;  %1700 = vmatpush3.msk.msra.mxu0 %vm803_vm3, %v770_v10  ;;  %s1790_s20 = smov 56   ;;  %vm1062_vm1 = vcmask 195712  }
  0x25   : > { %348 = vst.msk [vmem:[#allocation2 + $0x81] sm:$0xff] %vm312_vm0, %v311_v62  ;;  %359 = vst.msk [vmem:[#allocation3 + $0x10] sm:$0xff] %vm312_vm0, %v464_v63  ;;  %v416_v7 = vld [vmem:[#allocation2 + $0x22] sm:$0xff]  ;;  %v368_v8 = vld [vmem:[#allocation2 + $0x31] sm:$0xff]  ;;  %1701 = vmatprep.subr.mxu0 %v769_v11  ;;  %s1791_s23 = smov 40   ;;  %vm1111_vm2 = vcmask 261312  }
  0x26   : > { %v466_v2 = vld [vmem:[#allocation2 + $0x40] sm:$0xff]  ;;  %360 = vst.msk [vmem:[#allocation3 + $0x18] sm:$0xff] %vm312_vm0, %v465_v1  ;;  %481 = vrot.lane.b32.xlu1 %v464_v63, %s1783_s26  ;;  %v417_v9 = vld [vmem:[#allocation2 + $0x32] sm:$0xff]  ;;  %1702 = vmatpush3.msra.mxu0 %v769_v11  ;;  %vm1160_vm3 = vcmask 326912  }
  0x27   : > { %479 = vrot.lane.b32.xlu0 %v463_v61, %s1783_s26  ;;  %361 = vst.msk [vmem:[#allocation3 + $0x20] sm:$0xff] %vm312_vm0, %v466_v2  ;;  %v768_v12 = vld [vmem:[%s2363_s1 + $0x10] sm:$0xff]  ;;  %v766_v14 = vld [vmem:[%s2363_s1] sm:$0xff] }
  0x28   : > { %v467_v4 = vld [vmem:[#allocation2 + $0x50] sm:$0xff]  ;;  %1703 = vmatprep.subr.mxu0 %v768_v12  ;;  %v515_v15 = vld [vmem:[#allocation2 + $0x41] sm:$0xff]  ;;  %937 = vst.msk [vmem:[#allocation4 + $0x90] sm:$0x1] %vm927_vm14, %v1780_v0  ;;  %928 = vst.msk [vmem:[#allocation4] sm:$0x1] %vm927_vm14, %v1780_v0 }
  0x29   : > { %v1940_v5 = vld [vmem:[#allocation2 + $0x60] sm:$0xff]  ;;  %362 = vst.msk [vmem:[#allocation3 + $0x28] sm:$0xff] %vm312_vm0, %v467_v4  ;;  %1704 = vmatpush3.msra.mxu0 %v768_v12  ;;  %v370_v17 = vld [vmem:[#allocation2 + $0x51] sm:$0xff] }
  0x2a   : > { %363 = vst.msk [vmem:[#allocation3 + $0x30] sm:$0xff] %vm312_vm0, %v1940_v5  ;;  %385 = vrot.lane.b32.xlu1 %v367_v3, %s1781_s24  ;;  %1705 = vmatprep.subr.mxu0 %v767_v13  ;;  %v418_v16 = vld [vmem:[#allocation2 + $0x42] sm:$0xff]  ;;  %v419_v18 = vld [vmem:[#allocation2 + $0x52] sm:$0xff] }
  0x2b   : > { %v1943_v6 = vld [vmem:[#allocation2 + $0x70] sm:$0xff]  ;;  %528 = vrot.lane.b32.xlu0 %v366_v60, %s1784_s27  ;;  %1706 = vmatpush3.msra.mxu0 %v767_v13  ;;  %v517_v19 = vld [vmem:[#allocation2 + $0x61] sm:$0xff]  ;;  %929 = vst.msk [vmem:[#allocation4 + $0x10] sm:$0x1] %vm927_vm14, %v1780_v0  ;;  %930 = vst.msk [vmem:[#allocation4 + $0x20] sm:$0x1] %vm927_vm14, %v1780_v0 }
  0x2c   : > { %364 = vst.msk [vmem:[#allocation3 + $0x38] sm:$0xff] %vm312_vm0, %v1943_v6  ;;  %1707 = vmatprep.subr.mxu0 %v766_v14  ;;  %v372_v20 = vld [vmem:[#allocation2 + $0x71] sm:$0xff]  ;;  %v566_v21 = vld [vmem:[#allocation2 + $0x62] sm:$0xff]  ;;  %vm1013_vm0 = vcmask 130112  }
  0x2d   : > { %1708 = vmatpush3.msra.mxu0 %v766_v14  ;;  %v421_v22 = vld [vmem:[#allocation2 + $0x72] sm:$0xff]  ;;  %v470_v23 = vld [vmem:[#allocation2 + $0x80] sm:$0xff]  ;;  %931 = vst.msk [vmem:[#allocation4 + $0x30] sm:$0x1] %vm927_vm14, %v1780_v0  ;;  %932 = vst.msk [vmem:[#allocation4 + $0x40] sm:$0x1] %vm927_vm14, %v1780_v0 }
  0x2e   : > { %577 = vrot.lane.b32.xlu1 %v415_v59, %s1785_s28  ;;  %v519_v24 = vld [vmem:[#allocation2 + $0x81] sm:$0xff]  ;;  %v618_v28 = vld [vmem:[#allocation2 + $0x90] sm:$0xff]  ;;  %933 = vst.msk [vmem:[#allocation4 + $0x50] sm:$0x1] %vm927_vm14, %v1780_v0  ;;  %934 = vst.msk [vmem:[#allocation4 + $0x60] sm:$0x1] %vm927_vm14, %v1780_v0 }
  0x2f   : > { %530 = vrot.lane.b32.xlu0 %v367_v3, %s1784_s27  ;;  %v568_v27 = vld [vmem:[#allocation2 + $0x82] sm:$0xff]  ;;  %v667_v29 = vld [vmem:[#allocation2 + $0x91] sm:$0xff]  ;;  %935 = vst.msk [vmem:[#allocation4 + $0x70] sm:$0x1] %vm927_vm14, %v1780_v0  ;;  %936 = vst.msk [vmem:[#allocation4 + $0x80] sm:$0x1] %vm927_vm14, %v1780_v0 }
  0x30   : > { %v716_v32 = vld [vmem:[#allocation2 + $0x92] sm:$0xff]  ;;  %939 = vst.msk [vmem:[#allocation4 + $0x19] sm:$0x1] %vm927_vm14, %v1780_v0  ;;  %940 = vst.msk [vmem:[#allocation4 + $0x29] sm:$0x1] %vm927_vm14, %v1780_v0 }
  0x31   : > { %941 = vst.msk [vmem:[#allocation4 + $0x39] sm:$0x1] %vm927_vm14, %v1780_v0  ;;  %942 = vst.msk [vmem:[#allocation4 + $0x49] sm:$0x1] %vm927_vm14, %v1780_v0 }
  0x32   : > { %434 = vrot.lane.b32.xlu1 %v416_v7, %s1782_s25  ;;  %943 = vst.msk [vmem:[#allocation4 + $0x59] sm:$0x1] %vm927_vm14, %v1780_v0  ;;  %944 = vst.msk [vmem:[#allocation4 + $0x69] sm:$0x1] %vm927_vm14, %v1780_v0 }
  0x33   : > { %387 = vrot.lane.b32.xlu0 %v368_v8, %s1781_s24  ;;  %945 = vst.msk [vmem:[#allocation4 + $0x79] sm:$0x1] %vm927_vm14, %v1780_v0  ;;  %946 = vst.msk [vmem:[#allocation4 + $0x89] sm:$0x1] %vm927_vm14, %v1780_v0 }
  0x34   : > { %923 = vst.msk [vmem:[#allocation4 + $0x8] sm:$0x3] %vm922_vm15, %v1780_v0  ;;  %926 = vst.msk [vmem:[#allocation4 + $0x98] sm:$0x3] %vm922_vm15, %v1780_v0 }
  0x35   : > { %938 = vst.msk [vmem:[#allocation4 + $0x9] sm:$0x1] %vm927_vm14, %v1780_v0  ;;  %947 = vst.msk [vmem:[#allocation4 + $0x99] sm:$0x1] %vm927_vm14, %v1780_v0 }
  0x36   : > { %627 = vrot.lane.b32.xlu1 %v464_v63, %s1786_s29 }
  0x37   : > { %579 = vrot.lane.b32.xlu0 %v416_v7, %s1785_s28 }
  0x3a   : > { %483 = vrot.lane.b32.xlu1 %v465_v1, %s1783_s26 }
  0x3b   : > { %436 = vrot.lane.b32.xlu0 %v417_v9, %s1782_s25  ;;  %v1275_v0 = vld [vmem:[#allocation4 + $0x91] sm:$0xff] }
  0x3e   : > { %676 = vrot.lane.b32.xlu1 %v367_v3, %s1787_s7 }
  0x3f   : > { %629 = vrot.lane.b32.xlu0 %v465_v1, %s1786_s29 }
  0x42   : > { %532 = vrot.lane.b32.xlu1 %v368_v8, %s1784_s27 }
  0x43   : > { %485 = vrot.lane.b32.xlu0 %v466_v2, %s1783_s26 }
  0x46   : > { %725 = vrot.lane.b32.xlu1 %v416_v7, %s1788_s14 }
  0x47   : > { %678 = vrot.lane.b32.xlu0 %v368_v8, %s1787_s7 }
  0x4a   : > { %534 = vrot.lane.b32.xlu1 %v515_v15, %s1784_s27 }
  0x4b   : > { %389 = vrot.lane.b32.xlu0 %v515_v15, %s1781_s24 }
  0x4e   : > { %727 = vrot.lane.b32.xlu1 %v417_v9, %s1788_s14 }
  0x4f   : > { %581 = vrot.lane.b32.xlu0 %v417_v9, %s1785_s28 }
  0x52   : > { %438 = vrot.lane.b32.xlu1 %v418_v16, %s1782_s25 }
  0x53   : > { %391 = vrot.lane.b32.xlu0 %v370_v17, %s1781_s24 }
  0x56   : > { %631 = vrot.lane.b32.xlu1 %v466_v2, %s1786_s29 }
  0x57   : > { %583 = vrot.lane.b32.xlu0 %v418_v16, %s1785_s28 }
  0x5a   : > { %487 = vrot.lane.b32.xlu1 %v467_v4, %s1783_s26 }
  0x5b   : > { %440 = vrot.lane.b32.xlu0 %v419_v18, %s1782_s25 }
  0x5e   : > { %680 = vrot.lane.b32.xlu1 %v515_v15, %s1787_s7 }
  0x5f   : > { %633 = vrot.lane.b32.xlu0 %v467_v4, %s1786_s29 }
  0x62   : > { %536 = vrot.lane.b32.xlu1 %v370_v17, %s1784_s27 }
  0x63   : > { %489 = vrot.lane.b32.xlu0 %v1940_v5, %s1783_s26 }
  0x66   : > { %729 = vrot.lane.b32.xlu1 %v418_v16, %s1788_s14 }
  0x67   : > { %682 = vrot.lane.b32.xlu0 %v370_v17, %s1787_s7 }
  0x6a   : > { %538 = vrot.lane.b32.xlu1 %v517_v19, %s1784_s27 }
  0x6b   : > { %393 = vrot.lane.b32.xlu0 %v517_v19, %s1781_s24 }
  0x6e   : > { %731 = vrot.lane.b32.xlu1 %v419_v18, %s1788_s14 }
  0x6f   : > { %585 = vrot.lane.b32.xlu0 %v419_v18, %s1785_s28 }
  0x72   : > { %442 = vrot.lane.b32.xlu1 %v566_v21, %s1782_s25 }
  0x73   : > { %395 = vrot.lane.b32.xlu0 %v372_v20, %s1781_s24  ;;  %s1792_s24 = smov 64  }
  0x76   : > { %635 = vrot.lane.b32.xlu1 %v1940_v5, %s1786_s29 }
  0x77   : > { %587 = vrot.lane.b32.xlu0 %v566_v21, %s1785_s28 }
  0x7a   : > { %491 = vrot.lane.b32.xlu1 %v1943_v6, %s1783_s26 }
  0x7b   : > { %444 = vrot.lane.b32.xlu0 %v421_v22, %s1782_s25 }
  0x7e   : > { %684 = vrot.lane.b32.xlu1 %v517_v19, %s1787_s7 }
  0x7f   : > { %637 = vrot.lane.b32.xlu0 %v1943_v6, %s1786_s29 }
  0x82   : > { %540 = vrot.lane.b32.xlu1 %v372_v20, %s1784_s27 }
  0x83   : > { %493 = vrot.lane.b32.xlu0 %v470_v23, %s1783_s26 }
  0x86   : > { %733 = vrot.lane.b32.xlu1 %v566_v21, %s1788_s14 }
  0x87   : > { %686 = vrot.lane.b32.xlu0 %v372_v20, %s1787_s7  ;;  %v382_v25 = vpop.permute.xlu0 %381 }
  0x88   : > { %406 = vst.msk [vmem:[#allocation3] sm:$0xff] %vm405_vm4, %v382_v25 }
  0x8a   : > { %589 = vrot.lane.b32.xlu1 %v421_v22, %s1785_s28 }
  0x8b   : > { %542 = vrot.lane.b32.xlu0 %v519_v24, %s1784_s27 }
  0x8e   : > { %591 = vrot.lane.b32.xlu1 %v568_v27, %s1785_s28 }
  0x8f   : > { %735 = vrot.lane.b32.xlu0 %v421_v22, %s1788_s14 }
  0x90   : > { %v431_v26 = vpop.permute.xlu1 %430 }
  0x91   : > { %455 = vst.msk [vmem:[#allocation3] sm:$0xff] %vm454_vm5, %v431_v26 }
  0x92   : > { %641 = vrot.lane.b32.xlu1 %v618_v28, %s1786_s29 }
  0x93   : > { %639 = vrot.lane.b32.xlu0 %v470_v23, %s1786_s29 }
  0x94   : > { %v433_v30 = vpop.permute.xlu1 %432 }
  0x95   : > { %v384_v31 = vpop.permute.xlu0 %383 }
  0x96   : > { %407 = vst.msk [vmem:[#allocation3 + $0x8] sm:$0xff] %vm405_vm4, %v384_v31  ;;  %690 = vrot.lane.b32.xlu1 %v667_v29, %s1787_s7 }
  0x97   : > { %456 = vst.msk [vmem:[#allocation3 + $0x8] sm:$0xff] %vm454_vm5, %v433_v30  ;;  %688 = vrot.lane.b32.xlu0 %v519_v24, %s1787_s7 }
  0x98   : > { %v482_v33 = vpop.permute.xlu1 %481 }
  0x99   : > { %v480_v34 = vpop.permute.xlu0 %479  ;;  %505 = vst.msk [vmem:[#allocation3 + $0x8] sm:$0xff] %vm503_vm6, %v482_v33 }
  0x9a   : > { %504 = vst.msk [vmem:[#allocation3] sm:$0xff] %vm503_vm6, %v480_v34  ;;  %739 = vrot.lane.b32.xlu1 %v716_v32, %s1788_s14 }
  0x9b   : > { %737 = vrot.lane.b32.xlu0 %v568_v27, %s1788_s14 }
  0x9c   : > { %v386_v35 = vpop.permute.xlu1 %385 }
  0x9d   : > { %v529_v36 = vpop.permute.xlu0 %528  ;;  %408 = vst.msk [vmem:[#allocation3 + $0x10] sm:$0xff] %vm405_vm4, %v386_v35 }
  0x9e   : > { %553 = vst.msk [vmem:[#allocation3] sm:$0xff] %vm552_vm7, %v529_v36  ;;  %v1226_v36 = vld [vmem:[#allocation4 + $0x90] sm:$0xff] }
  0x9f   : > { %1249 = vrot.lane.b32.xlu1 %v1226_v36, %s1789_s17 }
  0xa0   : > { %v578_v37 = vpop.permute.xlu1 %577 }
  0xa1   : > { %v531_v38 = vpop.permute.xlu0 %530  ;;  %602 = vst.msk [vmem:[#allocation3] sm:$0xff] %vm601_vm8, %v578_v37  ;;  %v973_v37 = vld [vmem:[#allocation4 + $0x1] sm:$0xff] }
  0xa2   : > { %554 = vst.msk [vmem:[#allocation3 + $0x8] sm:$0xff] %vm552_vm7, %v531_v38  ;;  %989 = vrot.lane.b32.xlu0 %v973_v37, %s1782_s25  ;;  %v1022_v38 = vld [vmem:[#allocation4 + $0x2] sm:$0xff] }
  0xa3   : > { %1298 = vrot.lane.b32.xlu1 %v1275_v0, %s1790_s20 }
  0xa4   : > { %v435_v39 = vpop.permute.xlu1 %434 }
  0xa5   : > { %v388_v40 = vpop.permute.xlu0 %387  ;;  %457 = vst.msk [vmem:[#allocation3 + $0x10] sm:$0xff] %vm454_vm5, %v435_v39 }
  0xa6   : > { %409 = vst.msk [vmem:[#allocation3 + $0x18] sm:$0xff] %vm405_vm4, %v388_v40  ;;  %1038 = vrot.lane.b32.xlu0 %v1022_v38, %s1784_s27 }
  0xa8   : > { %v628_v41 = vpop.permute.xlu1 %627 }
  0xa9   : > { %v580_v42 = vpop.permute.xlu0 %579  ;;  %652 = vst.msk [vmem:[#allocation3] sm:$0xff] %vm651_vm9, %v628_v41  ;;  %v957_v41 = vld [vmem:[#allocation4] sm:$0xff] }
  0xaa   : > { %603 = vst.msk [vmem:[#allocation3 + $0x8] sm:$0xff] %vm601_vm8, %v580_v42 }
  0xab   : > { %965 = vst.msk [vmem:[#allocation5] sm:$0xff] %vm920_vm13, %v957_v41 }
  0xac   : > { %v484_v43 = vpop.permute.xlu1 %483 }
  0xad   : > { %v437_v44 = vpop.permute.xlu0 %436  ;;  %506 = vst.msk [vmem:[#allocation3 + $0x10] sm:$0xff] %vm503_vm6, %v484_v43 }
  0xae   : > { %458 = vst.msk [vmem:[#allocation3 + $0x18] sm:$0xff] %vm454_vm5, %v437_v44  ;;  %v2156_v44 = vld [vmem:[%s2364_s2] ss:$0 sm:$0xff] }
  0xb0   : > { %v677_v45 = vpop.permute.xlu1 %676 }
  0xb1   : > { %v630_v46 = vpop.permute.xlu0 %629  ;;  %701 = vst.msk [vmem:[#allocation3] sm:$0xff] %vm700_vm10, %v677_v45 }
  0xb2   : > { %653 = vst.msk [vmem:[#allocation3 + $0x8] sm:$0xff] %vm651_vm9, %v630_v46 }
  0xb4   : > { %v533_v47 = vpop.permute.xlu1 %532 }
  0xb5   : > { %v486_v48 = vpop.permute.xlu0 %485  ;;  %555 = vst.msk [vmem:[#allocation3 + $0x10] sm:$0xff] %vm552_vm7, %v533_v47 }
  0xb6   : > { %507 = vst.msk [vmem:[#allocation3 + $0x18] sm:$0xff] %vm503_vm6, %v486_v48 }
  0xb8   : > { %v726_v49 = vpop.permute.xlu1 %725 }
  0xb9   : > { %v679_v50 = vpop.permute.xlu0 %678  ;;  %750 = vst.msk [vmem:[#allocation3] sm:$0xff] %vm749_vm11, %v726_v49 }
  0xba   : > { %702 = vst.msk [vmem:[#allocation3 + $0x8] sm:$0xff] %vm700_vm10, %v679_v50 }
  0xbc   : > { %v535_v51 = vpop.permute.xlu1 %534 }
  0xbd   : > { %v390_v52 = vpop.permute.xlu0 %389  ;;  %556 = vst.msk [vmem:[#allocation3 + $0x18] sm:$0xff] %vm552_vm7, %v535_v51 }
  0xbe   : > { %410 = vst.msk [vmem:[#allocation3 + $0x20] sm:$0xff] %vm405_vm4, %v390_v52 }
  0xc0   : > { %v728_v53 = vpop.permute.xlu1 %727  ;;  %v758_v55 = vld [vmem:[#allocation3] sm:$0xff] }
  0xc1   : > { %v582_v54 = vpop.permute.xlu0 %581  ;;  %751 = vst.msk [vmem:[#allocation3 + $0x8] sm:$0xff] %vm749_vm11, %v728_v53  ;;  %1709 = vmatprep.mubr.msk.f32.mxu0 %vm778_vm12, %v758_v55 }
  0xc2   : > { %604 = vst.msk [vmem:[#allocation3 + $0x10] sm:$0xff] %vm601_vm8, %v582_v54 }
  0xc4   : > { %v439_v56 = vpop.permute.xlu1 %438 }
  0xc5   : > { %v392_v57 = vpop.permute.xlu0 %391  ;;  %459 = vst.msk [vmem:[#allocation3 + $0x20] sm:$0xff] %vm454_vm5, %v439_v56 }
  0xc6   : > { %411 = vst.msk [vmem:[#allocation3 + $0x28] sm:$0xff] %vm405_vm4, %v392_v57 }
  0xc8   : > { %v632_v58 = vpop.permute.xlu1 %631  ;;  %v759_v60 = vld [vmem:[#allocation3 + $0x8] sm:$0xff] }
  0xc9   : > { %v584_v59 = vpop.permute.xlu0 %583  ;;  %654 = vst.msk [vmem:[#allocation3 + $0x10] sm:$0xff] %vm651_vm9, %v632_v58  ;;  %1710 = vmatmul.mubr.msk.f32.vlgmr.msra.gmra.mxu0 %vm778_vm12, %v759_v60 }
  0xca   : > { %605 = vst.msk [vmem:[#allocation3 + $0x18] sm:$0xff] %vm601_vm8, %v584_v59 }
  0xcc   : > { %v488_v61 = vpop.permute.xlu1 %487 }
  0xcd   : > { %v441_v62 = vpop.permute.xlu0 %440  ;;  %508 = vst.msk [vmem:[#allocation3 + $0x20] sm:$0xff] %vm503_vm6, %v488_v61 }
  0xce   : > { %460 = vst.msk [vmem:[#allocation3 + $0x28] sm:$0xff] %vm454_vm5, %v441_v62 }
  0xd0   : > { %v681_v63 = vpop.permute.xlu1 %680 }
  0xd1   : > { %v634_v1 = vpop.permute.xlu0 %633  ;;  %703 = vst.msk [vmem:[#allocation3 + $0x10] sm:$0xff] %vm700_vm10, %v681_v63 }
  0xd2   : > { %655 = vst.msk [vmem:[#allocation3 + $0x18] sm:$0xff] %vm651_vm9, %v634_v1 }
  0xd4   : > { %v537_v2 = vpop.permute.xlu1 %536 }
  0xd5   : > { %v490_v3 = vpop.permute.xlu0 %489  ;;  %557 = vst.msk [vmem:[#allocation3 + $0x20] sm:$0xff] %vm552_vm7, %v537_v2 }
  0xd6   : > { %509 = vst.msk [vmem:[#allocation3 + $0x28] sm:$0xff] %vm503_vm6, %v490_v3 }
  0xd8   : > { %v730_v4 = vpop.permute.xlu1 %729 }
  0xd9   : > { %v683_v5 = vpop.permute.xlu0 %682  ;;  %752 = vst.msk [vmem:[#allocation3 + $0x10] sm:$0xff] %vm749_vm11, %v730_v4  ;;  %v1382_v4 = vld [vmem:[%s2365_s3 + $0x40] sm:$0xff] }
  0xda   : > { %704 = vst.msk [vmem:[#allocation3 + $0x18] sm:$0xff] %vm700_vm10, %v683_v5  ;;  %1721 = vmatprep.subr.mxu1 %v1382_v4  ;;  %v1381_v5 = vld [vmem:[%s2365_s3 + $0x38] sm:$0xff] }
  0xdb   : > { %1722 = vmatpush3.msra.mxu1 %v1382_v4 }
  0xdc   : > { %v539_v6 = vpop.permute.xlu1 %538  ;;  %1723 = vmatprep.subr.mxu1 %v1381_v5 }
  0xdd   : > { %v394_v7 = vpop.permute.xlu0 %393  ;;  %558 = vst.msk [vmem:[#allocation3 + $0x28] sm:$0xff] %vm552_vm7, %v539_v6  ;;  %1724 = vmatpush3.msra.mxu1 %v1381_v5 }
  0xde   : > { %412 = vst.msk [vmem:[#allocation3 + $0x30] sm:$0xff] %vm405_vm4, %v394_v7  ;;  %v1380_v7 = vld [vmem:[%s2365_s3 + $0x30] sm:$0xff] }
  0xdf   : > { %1725 = vmatprep.subr.mxu1 %v1380_v7 }
  0xe0   : > { %v732_v8 = vpop.permute.xlu1 %731  ;;  %v760_v10 = vld [vmem:[#allocation3 + $0x10] sm:$0xff]  ;;  %1726 = vmatpush3.msra.mxu1 %v1380_v7 }
  0xe1   : > { %v586_v9 = vpop.permute.xlu0 %585  ;;  %753 = vst.msk [vmem:[#allocation3 + $0x18] sm:$0xff] %vm749_vm11, %v732_v8  ;;  %1712 = vmatprep.mubr.msk.f32.mxu0 %vm778_vm12, %v760_v10  ;;  %v1379_v8 = vld [vmem:[%s2365_s3 + $0x28] sm:$0xff]  ;;  %v1378_v10 = vld [vmem:[%s2365_s3 + $0x20] sm:$0xff] }
  0xe2   : > { %606 = vst.msk [vmem:[#allocation3 + $0x20] sm:$0xff] %vm601_vm8, %v586_v9  ;;  %1727 = vmatprep.subr.mxu1 %v1379_v8 }
  0xe3   : > { %1728 = vmatpush3.msra.mxu1 %v1379_v8 }
  0xe4   : > { %v443_v12 = vpop.permute.xlu1 %442  ;;  %1729 = vmatprep.subr.mxu1 %v1378_v10 }
  0xe5   : > { %v396_v11 = vpop.permute.xlu0 %395  ;;  %461 = vst.msk [vmem:[#allocation3 + $0x30] sm:$0xff] %vm454_vm5, %v443_v12  ;;  %v1377_v12 = vld [vmem:[%s2365_s3 + $0x18] sm:$0xff]  ;;  %1730 = vmatpush3.msra.mxu1 %v1378_v10 }
  0xe6   : > { %413 = vst.msk [vmem:[#allocation3 + $0x38] sm:$0xff] %vm405_vm4, %v396_v11  ;;  %1731 = vmatprep.subr.mxu1 %v1377_v12  ;;  %vm1209_vm4 = vcmask 392512  }
  0xe7   : > { %1732 = vmatpush3.msra.mxu1 %v1377_v12 }
  0xe8   : > { %v761_v14 = vld [vmem:[#allocation3 + $0x18] sm:$0xff]  ;;  %v636_v15 = vpop.permute.xlu1 %635 }
  0xe9   : > { %v588_v13 = vpop.permute.xlu0 %587  ;;  %1713 = vmatmul.mubr.msk.f32.gmra.mxu0 %vm778_vm12, %v761_v14  ;;  %656 = vst.msk [vmem:[#allocation3 + $0x20] sm:$0xff] %vm651_vm9, %v636_v15 }
  0xea   : > { %607 = vst.msk [vmem:[#allocation3 + $0x28] sm:$0xff] %vm601_vm8, %v588_v13 }
  0xec   : > { %v492_v17 = vpop.permute.xlu1 %491 }
  0xed   : > { %v445_v16 = vpop.permute.xlu0 %444  ;;  %510 = vst.msk [vmem:[#allocation3 + $0x30] sm:$0xff] %vm503_vm6, %v492_v17  ;;  %v1376_v17 = vld [vmem:[%s2365_s3 + $0x10] sm:$0xff] }
  0xee   : > { %462 = vst.msk [vmem:[#allocation3 + $0x38] sm:$0xff] %vm454_vm5, %v445_v16  ;;  %1733 = vmatprep.subr.mxu1 %v1376_v17  ;;  %vm1259_vm5 = vcmask 458112  }
  0xef   : > { %1734 = vmatpush3.msra.mxu1 %v1376_v17 }
  0xf0   : > { %v685_v19 = vpop.permute.xlu1 %684 }
  0xf1   : > { %v638_v18 = vpop.permute.xlu0 %637  ;;  %705 = vst.msk [vmem:[#allocation3 + $0x20] sm:$0xff] %vm700_vm10, %v685_v19  ;;  %v1375_v19 = vld [vmem:[%s2365_s3 + $0x8] sm:$0xff] }
  0xf2   : > { %657 = vst.msk [vmem:[#allocation3 + $0x28] sm:$0xff] %vm651_vm9, %v638_v18  ;;  %1735 = vmatprep.subr.mxu1 %v1375_v19 }
  0xf3   : > { %1736 = vmatpush3.msra.mxu1 %v1375_v19 }
  0xf4   : > { %v541_v21 = vpop.permute.xlu1 %540 }
  0xf5   : > { %v494_v20 = vpop.permute.xlu0 %493  ;;  %559 = vst.msk [vmem:[#allocation3 + $0x30] sm:$0xff] %vm552_vm7, %v541_v21 }
  0xf6   : > { %511 = vst.msk [vmem:[#allocation3 + $0x38] sm:$0xff] %vm503_vm6, %v494_v20  ;;  %v1374_v20 = vld [vmem:[%s2365_s3] sm:$0xff]  ;;  %vm1308_vm6 = vcmask 523712  }
  0xf7   : > { %1737 = vmatprep.subr.mxu1 %v1374_v20 }
  0xf8   : > { %v734_v23 = vpop.permute.xlu1 %733  ;;  %1738 = vmatpush3.msra.mxu1 %v1374_v20 }
  0xf9   : > { %v687_v22 = vpop.permute.xlu0 %686  ;;  %754 = vst.msk [vmem:[#allocation3 + $0x20] sm:$0xff] %vm749_vm11, %v734_v23 }
  0xfa   : > { %706 = vst.msk [vmem:[#allocation3 + $0x28] sm:$0xff] %vm700_vm10, %v687_v22 }
  0xfc   : > { %v590_v25 = vpop.permute.xlu1 %589 }
  0xfd   : > { %v543_v24 = vpop.permute.xlu0 %542  ;;  %608 = vst.msk [vmem:[#allocation3 + $0x30] sm:$0xff] %vm601_vm8, %v590_v25 }
  0xfe   : > { %560 = vst.msk [vmem:[#allocation3 + $0x38] sm:$0xff] %vm552_vm7, %v543_v24  ;;  %vm1357_vm7 = vcmask 589312  }
 0x100   : > { %v762_v27 = vld [vmem:[#allocation3 + $0x20] sm:$0xff]  ;;  %v592_v28 = vpop.permute.xlu1 %591 }
 0x101   : > { %v736_v26 = vpop.permute.xlu0 %735  ;;  %1715 = vmatprep.mubr.msk.f32.mxu0 %vm778_vm12, %v762_v27  ;;  %609 = vst.msk [vmem:[#allocation3 + $0x38] sm:$0xff] %vm601_vm8, %v592_v28  ;;  %vm1390_vm8 = vcmask 588800  }
 0x102   : > { %755 = vst.msk [vmem:[#allocation3 + $0x28] sm:$0xff] %vm749_vm11, %v736_v26 }
 0x104   : > { %v642_v30 = vpop.permute.xlu1 %641 }
 0x105   : > { %v640_v29 = vpop.permute.xlu0 %639  ;;  %659 = vst.msk [vmem:[#allocation3 + $0x38] sm:$0xff] %vm651_vm9, %v642_v30 }
 0x106   : > { %658 = vst.msk [vmem:[#allocation3 + $0x30] sm:$0xff] %vm651_vm9, %v640_v29 }
 0x108   : > { %v691_v33 = vpop.permute.xlu1 %690 }
 0x109   : > { %v763_v31 = vld [vmem:[#allocation3 + $0x28] sm:$0xff]  ;;  %v689_v32 = vpop.permute.xlu0 %688  ;;  %708 = vst.msk [vmem:[#allocation3 + $0x38] sm:$0xff] %vm700_vm10, %v691_v33 }
 0x10a   : > { %1716 = vmatmul.mubr.msk.f32.gmra.mxu0 %vm778_vm12, %v763_v31  ;;  %707 = vst.msk [vmem:[#allocation3 + $0x30] sm:$0xff] %vm700_vm10, %v689_v32 }
 0x10c   : > { %v740_v35 = vpop.permute.xlu1 %739 }
 0x10d   : > { %v738_v34 = vpop.permute.xlu0 %737  ;;  %757 = vst.msk [vmem:[#allocation3 + $0x38] sm:$0xff] %vm749_vm11, %v740_v35 }
 0x10e   : > { %756 = vst.msk [vmem:[#allocation3 + $0x30] sm:$0xff] %vm749_vm11, %v738_v34 }
 0x111   : > { %v2256_v37 = vpop.permute.xlu1 %1249 }
 0x114   : > { %v765_v40 = vld [vmem:[#allocation3 + $0x38] sm:$0xff]  ;;  %v990_v42 = vpop.permute.xlu0 %989 }
 0x115   : > { %v764_v39 = vld [vmem:[#allocation3 + $0x30] sm:$0xff]  ;;  %1014 = vst.msk [vmem:[#allocation5] sm:$0xff] %vm1013_vm0, %v990_v42  ;;  %v2262_v38 = vpop.permute.xlu1 %1298 }
 0x116   : > { %1718 = vmatprep.mubr.msk.f32.mxu0 %vm778_vm12, %v764_v39 }
 0x117   : > { %1719 = vmatmul.mubr.msk.f32.gmra.mxu0 %vm778_vm12, %v765_v40  ;;  %v1324_v40 = vld [vmem:[#allocation4 + $0x92] sm:$0xff] }
 0x118   : > { %v1039_v43 = vpop.permute.xlu0 %1038 }
 0x119   : > { %1063 = vst.msk [vmem:[#allocation5] sm:$0xff] %vm1062_vm1, %v1039_v43 }
 0x189   : > { %v1711_v45 = vpop.f32.mrf.mxu0 }
 0x18a   : > { %v879_v46 = vadd.f32 %v1711_v45, %v2156_v44 }
 0x18b   : > { %v873_v47 = vpop.f32.mrf.mxu0 }
 0x18c   : > { %v913_v48 = vmax.f32 %v879_v46, 0.0  ;;  %v874_v49 = vadd.f32 %v2156_v44, %v873_v47 }
 0x18e   : > { %950 = vst.msk [vmem:[#allocation4 + $0x21] sm:$0xff] %vm920_vm13, %v913_v48  ;;  %v912_v50 = vmax.f32 %v874_v49, 0.0 }
 0x190   : > { %949 = vst.msk [vmem:[#allocation4 + $0x11] sm:$0xff] %vm920_vm13, %v912_v50 }
 0x195   : > { %v1121_v51 = vld [vmem:[#allocation4 + $0x21] sm:$0xff] }
 0x196   : > { %v1072_v52 = vld [vmem:[#allocation4 + $0x20] sm:$0xff]  ;;  %1138 = vrot.lane.b32.xlu0 %v1121_v51, %s1788_s14 }
 0x197   : > { %1089 = vrot.lane.b32.xlu1 %v1072_v52, %s1786_s29  ;;  %967 = vst.msk [vmem:[#allocation5 + $0x10] sm:$0xff] %vm920_vm13, %v1072_v52  ;;  %v1071_v53 = vld [vmem:[#allocation4 + $0x10] sm:$0xff]  ;;  %v1170_v54 = vld [vmem:[#allocation4 + $0x22] sm:$0xff] }
 0x198   : > { %966 = vst.msk [vmem:[#allocation5 + $0x8] sm:$0xff] %vm920_vm13, %v1071_v53  ;;  %v1120_v55 = vld [vmem:[#allocation4 + $0x11] sm:$0xff] }
 0x199   : > { %v1023_v62 = vld [vmem:[#allocation4 + $0x12] sm:$0xff] }
 0x19a   : > { %1187 = vrot.lane.b32.xlu0 %v1170_v54, %s1791_s23 }
 0x19b   : > { %993 = vrot.lane.b32.xlu1 %v1121_v51, %s1782_s25 }
 0x19e   : > { %1087 = vrot.lane.b32.xlu0 %v1071_v53, %s1786_s29 }
 0x19f   : > { %1042 = vrot.lane.b32.xlu1 %v1170_v54, %s1784_s27 }
 0x1a2   : > { %1136 = vrot.lane.b32.xlu0 %v1120_v55, %s1788_s14 }
 0x1a3   : > { %1235 = vrot.lane.b32.xlu1 %v1072_v52, %s1789_s17 }
 0x1a7   : > { %1284 = vrot.lane.b32.xlu1 %v1121_v51, %s1790_s20 }
 0x1a9   : > { %v1714_v56 = vpop.f32.mrf.mxu0 }
 0x1aa   : > { %v889_v57 = vadd.f32 %v1714_v56, %v2156_v44 }
 0x1ab   : > { %1333 = vrot.lane.b32.xlu1 %v1170_v54, %s1792_s24  ;;  %v883_v58 = vpop.f32.mrf.mxu0 }
 0x1ac   : > { %v915_v59 = vmax.f32 %v889_v57, 0.0  ;;  %v884_v60 = vadd.f32 %v2156_v44, %v883_v58 }
 0x1ae   : > { %952 = vst.msk [vmem:[#allocation4 + $0x41] sm:$0xff] %vm920_vm13, %v915_v59  ;;  %v914_v61 = vmax.f32 %v884_v60, 0.0 }
 0x1af   : > { %991 = vrot.lane.b32.xlu1 %v1120_v55, %s1782_s25 }
 0x1b0   : > { %951 = vst.msk [vmem:[#allocation4 + $0x31] sm:$0xff] %vm920_vm13, %v914_v61 }
 0x1b3   : > { %1040 = vrot.lane.b32.xlu1 %v1023_v62, %s1784_s27 }
 0x1b5   : > { %v1074_v63 = vld [vmem:[#allocation4 + $0x40] sm:$0xff] }
 0x1b6   : > { %1093 = vrot.lane.b32.xlu0 %v1074_v63, %s1786_s29  ;;  %969 = vst.msk [vmem:[#allocation5 + $0x20] sm:$0xff] %vm920_vm13, %v1074_v63  ;;  %v977_v2 = vld [vmem:[#allocation4 + $0x41] sm:$0xff] }
 0x1b7   : > { %1185 = vrot.lane.b32.xlu1 %v1023_v62, %s1791_s23  ;;  %v1220_v1 = vld [vmem:[#allocation4 + $0x30] sm:$0xff]  ;;  %v1172_v3 = vld [vmem:[#allocation4 + $0x42] sm:$0xff] }
 0x1b8   : > { %968 = vst.msk [vmem:[#allocation5 + $0x18] sm:$0xff] %vm920_vm13, %v1220_v1  ;;  %v976_v6 = vld [vmem:[#allocation4 + $0x31] sm:$0xff] }
 0x1b9   : > { %v1025_v9 = vld [vmem:[#allocation4 + $0x32] sm:$0xff] }
 0x1ba   : > { %997 = vrot.lane.b32.xlu0 %v977_v2, %s1782_s25 }
 0x1bb   : > { %1142 = vrot.lane.b32.xlu1 %v977_v2, %s1788_s14 }
 0x1be   : > { %1191 = vrot.lane.b32.xlu0 %v1172_v3, %s1791_s23 }
 0x1bf   : > { %1046 = vrot.lane.b32.xlu1 %v1172_v3, %s1784_s27 }
 0x1c2   : > { %995 = vrot.lane.b32.xlu0 %v976_v6, %s1782_s25 }
 0x1c3   : > { %1239 = vrot.lane.b32.xlu1 %v1074_v63, %s1789_s17 }
 0x1c6   : > { %1044 = vrot.lane.b32.xlu0 %v1025_v9, %s1784_s27 }
 0x1c7   : > { %1288 = vrot.lane.b32.xlu1 %v977_v2, %s1790_s20 }
 0x1ca   : > { %v1717_v11 = vpop.f32.mrf.mxu0  ;;  %1237 = vrot.lane.b32.xlu0 %v1220_v1, %s1789_s17 }
 0x1cb   : > { %v899_v13 = vadd.f32 %v1717_v11, %v2156_v44  ;;  %1337 = vrot.lane.b32.xlu1 %v1172_v3, %s1792_s24 }
 0x1cc   : > { %v893_v14 = vpop.f32.mrf.mxu0 }
 0x1cd   : > { %v917_v15 = vmax.f32 %v899_v13, 0.0  ;;  %v894_v16 = vadd.f32 %v2156_v44, %v893_v14 }
 0x1ce   : > { %1286 = vrot.lane.b32.xlu0 %v976_v6, %s1790_s20 }
 0x1cf   : > { %954 = vst.msk [vmem:[#allocation4 + $0x61] sm:$0xff] %vm920_vm13, %v917_v15  ;;  %v916_v18 = vmax.f32 %v894_v16, 0.0  ;;  %1091 = vrot.lane.b32.xlu1 %v1220_v1, %s1786_s29 }
 0x1d1   : > { %953 = vst.msk [vmem:[#allocation4 + $0x51] sm:$0xff] %vm920_vm13, %v916_v18 }
 0x1d2   : > { %1189 = vrot.lane.b32.xlu0 %v1025_v9, %s1791_s23 }
 0x1d3   : > { %1140 = vrot.lane.b32.xlu1 %v976_v6, %s1788_s14 }
 0x1d6   : > { %v1076_v21 = vld [vmem:[#allocation4 + $0x60] sm:$0xff] }
 0x1d7   : > { %1097 = vrot.lane.b32.xlu0 %v1076_v21, %s1786_s29  ;;  %1335 = vrot.lane.b32.xlu1 %v1025_v9, %s1792_s24  ;;  %v1720_v22 = vpop.f32.mrf.mxu0  ;;  %971 = vst.msk [vmem:[#allocation5 + $0x30] sm:$0xff] %vm920_vm13, %v1076_v21  ;;  %v979_v26 = vld [vmem:[#allocation4 + $0x61] sm:$0xff] }
 0x1d8   : > { %v909_v23 = vadd.f32 %v1720_v22, %v2156_v44  ;;  %v1222_v24 = vld [vmem:[#allocation4 + $0x50] sm:$0xff]  ;;  %v1174_v30 = vld [vmem:[#allocation4 + $0x62] sm:$0xff] }
 0x1d9   : > { %v903_v25 = vpop.f32.mrf.mxu0  ;;  %970 = vst.msk [vmem:[#allocation5 + $0x28] sm:$0xff] %vm920_vm13, %v1222_v24  ;;  %v978_v31 = vld [vmem:[#allocation4 + $0x51] sm:$0xff] }
 0x1da   : > { %v919_v27 = vmax.f32 %v909_v23, 0.0  ;;  %v904_v28 = vadd.f32 %v2156_v44, %v903_v25  ;;  %v1027_v33 = vld [vmem:[#allocation4 + $0x52] sm:$0xff] }
 0x1db   : > { %1001 = vrot.lane.b32.xlu0 %v979_v26, %s1782_s25  ;;  %1146 = vrot.lane.b32.xlu1 %v979_v26, %s1788_s14 }
 0x1dc   : > { %956 = vst.msk [vmem:[#allocation4 + $0x81] sm:$0xff] %vm920_vm13, %v919_v27  ;;  %v918_v29 = vmax.f32 %v904_v28, 0.0 }
 0x1de   : > { %955 = vst.msk [vmem:[#allocation4 + $0x71] sm:$0xff] %vm920_vm13, %v918_v29 }
 0x1df   : > { %1195 = vrot.lane.b32.xlu0 %v1174_v30, %s1791_s23  ;;  %1050 = vrot.lane.b32.xlu1 %v1174_v30, %s1784_s27 }
 0x1e3   : > { %999 = vrot.lane.b32.xlu0 %v978_v31, %s1782_s25  ;;  %1243 = vrot.lane.b32.xlu1 %v1076_v21, %s1789_s17  ;;  %v1078_v34 = vld [vmem:[#allocation4 + $0x80] sm:$0xff] }
 0x1e4   : > { %v1127_v35 = vld [vmem:[#allocation4 + $0x81] sm:$0xff] }
 0x1e5   : > { %v1077_v32 = vld [vmem:[#allocation4 + $0x70] sm:$0xff]  ;;  %v1176_v36 = vld [vmem:[#allocation4 + $0x82] sm:$0xff] }
 0x1e6   : > { %972 = vst.msk [vmem:[#allocation5 + $0x38] sm:$0xff] %vm920_vm13, %v1077_v32  ;;  %v1126_v0 = vld [vmem:[#allocation4 + $0x71] sm:$0xff] }
 0x1e7   : > { %1048 = vrot.lane.b32.xlu0 %v1027_v33, %s1784_s27  ;;  %1292 = vrot.lane.b32.xlu1 %v979_v26, %s1790_s20  ;;  %v1175_v39 = vld [vmem:[#allocation4 + $0x72] sm:$0xff] }
 0x1eb   : > { %1241 = vrot.lane.b32.xlu0 %v1222_v24, %s1789_s17  ;;  %1341 = vrot.lane.b32.xlu1 %v1174_v30, %s1792_s24 }
 0x1ef   : > { %1290 = vrot.lane.b32.xlu0 %v978_v31, %s1790_s20  ;;  %1095 = vrot.lane.b32.xlu1 %v1222_v24, %s1786_s29 }
 0x1f3   : > { %1193 = vrot.lane.b32.xlu0 %v1027_v33, %s1791_s23  ;;  %1144 = vrot.lane.b32.xlu1 %v978_v31, %s1788_s14 }
 0x1f7   : > { %1101 = vrot.lane.b32.xlu0 %v1078_v34, %s1786_s29  ;;  %1339 = vrot.lane.b32.xlu1 %v1027_v33, %s1792_s24 }
 0x1fb   : > { %1150 = vrot.lane.b32.xlu0 %v1127_v35, %s1788_s14  ;;  %1199 = vrot.lane.b32.xlu1 %v1176_v36, %s1791_s23 }
 0x1ff   : > { %1247 = vrot.lane.b32.xlu0 %v1078_v34, %s1789_s17  ;;  %1099 = vrot.lane.b32.xlu1 %v1077_v32, %s1786_s29  ;;  %s1668_s29 = sshll.u32 %s2369_s19, 6 }
 0x203   : > { %1296 = vrot.lane.b32.xlu0 %v1127_v35, %s1790_s20  ;;  %1148 = vrot.lane.b32.xlu1 %v1126_v0, %s1788_s14 }
 0x207   : > { %1003 = vrot.lane.b32.xlu0 %v1126_v0, %s1782_s25  ;;  %1197 = vrot.lane.b32.xlu1 %v1175_v39, %s1791_s23 }
 0x208   : > { %v1139_v41 = vpop.permute.xlu0 %1138 }
 0x209   : > { %v1090_v42 = vpop.permute.xlu1 %1089 }
 0x20b   : > { %1052 = vrot.lane.b32.xlu0 %v1175_v39, %s1784_s27  ;;  %1347 = vrot.lane.b32.xlu1 %v1324_v40, %s1792_s24 }
 0x20c   : > { %v1188_v43 = vpop.permute.xlu0 %1187 }
 0x20d   : > { %v994_v44 = vpop.permute.xlu1 %993 }
 0x20e   : > { %1016 = vst.msk [vmem:[#allocation5 + $0x10] sm:$0xff] %vm1013_vm0, %v994_v44 }
 0x20f   : > { %1245 = vrot.lane.b32.xlu0 %v1077_v32, %s1789_s17 }
 0x210   : > { %v1088_v46 = vpop.permute.xlu0 %1087 }
 0x211   : > { %v1043_v45 = vpop.permute.xlu1 %1042  ;;  %1112 = vst.msk [vmem:[#allocation5] sm:$0xff] %vm1111_vm2, %v1088_v46 }
 0x212   : > { %1065 = vst.msk [vmem:[#allocation5 + $0x10] sm:$0xff] %vm1062_vm1, %v1043_v45 }
 0x213   : > { %1294 = vrot.lane.b32.xlu0 %v1126_v0, %s1790_s20  ;;  %s224_s20 = scalar_lea.vmem %s2367_s5, %s1668_s29 }
 0x214   : > { %v1137_v48 = vpop.permute.xlu0 %1136 }
 0x215   : > { %v1236_v47 = vpop.permute.xlu1 %1235  ;;  %1161 = vst.msk [vmem:[#allocation5] sm:$0xff] %vm1160_vm3, %v1137_v48 }
 0x217   : > { %1343 = vrot.lane.b32.xlu0 %v1175_v39, %s1792_s24 }
 0x219   : > { %v1285_v49 = vpop.permute.xlu1 %1284 }
 0x21b   : > { %1345 = vrot.lane.b32.xlu0 %v1176_v36, %s1792_s24 }
 0x21d   : > { %v1334_v50 = vpop.permute.xlu1 %1333 }
 0x221   : > { %v992_v51 = vpop.permute.xlu1 %991 }
 0x222   : > { %1015 = vst.msk [vmem:[#allocation5 + $0x8] sm:$0xff] %vm1013_vm0, %v992_v51 }
 0x225   : > { %v1041_v52 = vpop.permute.xlu1 %1040 }
 0x226   : > { %1064 = vst.msk [vmem:[#allocation5 + $0x8] sm:$0xff] %vm1062_vm1, %v1041_v52 }
 0x227   : > { %1113 = vst.msk [vmem:[#allocation5 + $0x8] sm:$0xff] %vm1111_vm2, %v1090_v42 }
 0x228   : > { %1162 = vst.msk [vmem:[#allocation5 + $0x8] sm:$0xff] %vm1160_vm3, %v1139_v41  ;;  %v1094_v53 = vpop.permute.xlu0 %1093 }
 0x229   : > { %v1186_v54 = vpop.permute.xlu1 %1185  ;;  %1211 = vst.msk [vmem:[#allocation5 + $0x8] sm:$0xff] %vm1209_vm4, %v1188_v43 }
 0x22a   : > { %1210 = vst.msk [vmem:[#allocation5] sm:$0xff] %vm1209_vm4, %v1186_v54 }
 0x22b   : > { %1260 = vst.msk [vmem:[#allocation5] sm:$0xff] %vm1259_vm5, %v1236_v47 }
 0x22c   : > { %1309 = vst.msk [vmem:[#allocation5] sm:$0xff] %vm1308_vm6, %v1285_v49  ;;  %v998_v55 = vpop.permute.xlu0 %997 }
 0x22d   : > { %1358 = vst.msk [vmem:[#allocation5] sm:$0xff] %vm1357_vm7, %v1334_v50  ;;  %v1143_v56 = vpop.permute.xlu1 %1142 }
 0x22e   : > { %1018 = vst.msk [vmem:[#allocation5 + $0x20] sm:$0xff] %vm1013_vm0, %v998_v55 }
 0x230   : > { %v1192_v57 = vpop.permute.xlu0 %1191 }
 0x231   : > { %v1047_v58 = vpop.permute.xlu1 %1046 }
 0x232   : > { %1067 = vst.msk [vmem:[#allocation5 + $0x20] sm:$0xff] %vm1062_vm1, %v1047_v58 }
 0x234   : > { %v1366_v59 = vld [vmem:[#allocation5] sm:$0xff]  ;;  %v996_v60 = vpop.permute.xlu0 %995 }
 0x235   : > { %1739 = vmatprep.mubr.msk.f32.mxu1 %vm1390_vm8, %v1366_v59  ;;  %v1240_v61 = vpop.permute.xlu1 %1239  ;;  %1017 = vst.msk [vmem:[#allocation5 + $0x18] sm:$0xff] %vm1013_vm0, %v996_v60 }
 0x238   : > { %v1045_v62 = vpop.permute.xlu0 %1044 }
 0x239   : > { %v1289_v63 = vpop.permute.xlu1 %1288  ;;  %1066 = vst.msk [vmem:[#allocation5 + $0x18] sm:$0xff] %vm1062_vm1, %v1045_v62 }
 0x23a   : > { %1115 = vst.msk [vmem:[#allocation5 + $0x18] sm:$0xff] %vm1111_vm2, %v1094_v53 }
 0x23b   : > { %1164 = vst.msk [vmem:[#allocation5 + $0x18] sm:$0xff] %vm1160_vm3, %v1143_v56 }
 0x23c   : > { %1213 = vst.msk [vmem:[#allocation5 + $0x18] sm:$0xff] %vm1209_vm4, %v1192_v57  ;;  %v1238_v1 = vpop.permute.xlu0 %1237 }
 0x23d   : > { %v1338_v2 = vpop.permute.xlu1 %1337  ;;  %1261 = vst.msk [vmem:[#allocation5 + $0x8] sm:$0xff] %vm1259_vm5, %v1238_v1 }
 0x240   : > { %v1287_v3 = vpop.permute.xlu0 %1286 }
 0x241   : > { %v1092_v4 = vpop.permute.xlu1 %1091  ;;  %1310 = vst.msk [vmem:[#allocation5 + $0x8] sm:$0xff] %vm1308_vm6, %v1287_v3 }
 0x242   : > { %1114 = vst.msk [vmem:[#allocation5 + $0x10] sm:$0xff] %vm1111_vm2, %v1092_v4 }
 0x244   : > { %v1190_v5 = vpop.permute.xlu0 %1189 }
 0x245   : > { %v1141_v6 = vpop.permute.xlu1 %1140 }
 0x246   : > { %1163 = vst.msk [vmem:[#allocation5 + $0x10] sm:$0xff] %vm1160_vm3, %v1141_v6 }
 0x247   : > { %1212 = vst.msk [vmem:[#allocation5 + $0x10] sm:$0xff] %vm1209_vm4, %v1190_v5 }
 0x248   : > { %1262 = vst.msk [vmem:[#allocation5 + $0x10] sm:$0xff] %vm1259_vm5, %v1240_v61 }
 0x249   : > { %1311 = vst.msk [vmem:[#allocation5 + $0x10] sm:$0xff] %vm1308_vm6, %v1289_v63  ;;  %v1098_v7 = vpop.permute.xlu0 %1097  ;;  %v1336_v8 = vpop.permute.xlu1 %1335 }
 0x24a   : > { %1360 = vst.msk [vmem:[#allocation5 + $0x10] sm:$0xff] %vm1357_vm7, %v1338_v2  ;;  %1359 = vst.msk [vmem:[#allocation5 + $0x8] sm:$0xff] %vm1357_vm7, %v1336_v8 }
 0x24d   : > { %v1002_v9 = vpop.permute.xlu0 %1001  ;;  %v1147_v10 = vpop.permute.xlu1 %1146 }
 0x24e   : > { %1020 = vst.msk [vmem:[#allocation5 + $0x30] sm:$0xff] %vm1013_vm0, %v1002_v9 }
 0x251   : > { %v1196_v11 = vpop.permute.xlu0 %1195  ;;  %v1051_v12 = vpop.permute.xlu1 %1050  ;;  %v1367_v13 = vld [vmem:[#allocation5 + $0x8] sm:$0xff]  ;;  %v1368_v14 = vld [vmem:[#allocation5 + $0x10] sm:$0xff] }
 0x252   : > { %1069 = vst.msk [vmem:[#allocation5 + $0x30] sm:$0xff] %vm1062_vm1, %v1051_v12  ;;  %1740 = vmatmul.mubr.msk.f32.vlgmr.msra.gmra.mxu1 %vm1390_vm8, %v1367_v13 }
 0x253   : > { %1742 = vmatprep.mubr.msk.f32.mxu1 %vm1390_vm8, %v1368_v14 }
 0x255   : > { %v1000_v15 = vpop.permute.xlu0 %999  ;;  %v1244_v16 = vpop.permute.xlu1 %1243 }
 0x256   : > { %1019 = vst.msk [vmem:[#allocation5 + $0x28] sm:$0xff] %vm1013_vm0, %v1000_v15 }
 0x259   : > { %v1049_v17 = vpop.permute.xlu0 %1048  ;;  %v1293_v18 = vpop.permute.xlu1 %1292 }
 0x25a   : > { %1068 = vst.msk [vmem:[#allocation5 + $0x28] sm:$0xff] %vm1062_vm1, %v1049_v17 }
 0x25b   : > { %1117 = vst.msk [vmem:[#allocation5 + $0x28] sm:$0xff] %vm1111_vm2, %v1098_v7 }
 0x25c   : > { %1166 = vst.msk [vmem:[#allocation5 + $0x28] sm:$0xff] %vm1160_vm3, %v1147_v10 }
 0x25d   : > { %1215 = vst.msk [vmem:[#allocation5 + $0x28] sm:$0xff] %vm1209_vm4, %v1196_v11  ;;  %v1242_v19 = vpop.permute.xlu0 %1241  ;;  %v1342_v20 = vpop.permute.xlu1 %1341 }
 0x25e   : > { %1263 = vst.msk [vmem:[#allocation5 + $0x18] sm:$0xff] %vm1259_vm5, %v1242_v19 }
 0x261   : > { %v1291_v21 = vpop.permute.xlu0 %1290  ;;  %v1096_v22 = vpop.permute.xlu1 %1095 }
 0x262   : > { %1312 = vst.msk [vmem:[#allocation5 + $0x18] sm:$0xff] %vm1308_vm6, %v1291_v21 }
 0x263   : > { %1116 = vst.msk [vmem:[#allocation5 + $0x20] sm:$0xff] %vm1111_vm2, %v1096_v22 }
 0x265   : > { %v1194_v23 = vpop.permute.xlu0 %1193  ;;  %v1145_v24 = vpop.permute.xlu1 %1144 }
 0x266   : > { %1165 = vst.msk [vmem:[#allocation5 + $0x20] sm:$0xff] %vm1160_vm3, %v1145_v24 }
 0x267   : > { %1214 = vst.msk [vmem:[#allocation5 + $0x20] sm:$0xff] %vm1209_vm4, %v1194_v23 }
 0x268   : > { %1264 = vst.msk [vmem:[#allocation5 + $0x20] sm:$0xff] %vm1259_vm5, %v1244_v16 }
 0x269   : > { %1313 = vst.msk [vmem:[#allocation5 + $0x20] sm:$0xff] %vm1308_vm6, %v1293_v18  ;;  %v1102_v25 = vpop.permute.xlu0 %1101  ;;  %v1340_v26 = vpop.permute.xlu1 %1339 }
 0x26a   : > { %1362 = vst.msk [vmem:[#allocation5 + $0x20] sm:$0xff] %vm1357_vm7, %v1342_v20  ;;  %1361 = vst.msk [vmem:[#allocation5 + $0x18] sm:$0xff] %vm1357_vm7, %v1340_v26 }
 0x26d   : > { %v1151_v27 = vpop.permute.xlu0 %1150  ;;  %v1200_v28 = vpop.permute.xlu1 %1199 }
 0x271   : > { %v1248_v29 = vpop.permute.xlu0 %1247  ;;  %v1100_v30 = vpop.permute.xlu1 %1099  ;;  %v1369_v31 = vld [vmem:[#allocation5 + $0x18] sm:$0xff]  ;;  %v1370_v32 = vld [vmem:[#allocation5 + $0x20] sm:$0xff] }
 0x272   : > { %1118 = vst.msk [vmem:[#allocation5 + $0x30] sm:$0xff] %vm1111_vm2, %v1100_v30  ;;  %1743 = vmatmul.mubr.msk.f32.gmra.mxu1 %vm1390_vm8, %v1369_v31 }
 0x273   : > { %1745 = vmatprep.mubr.msk.f32.mxu1 %vm1390_vm8, %v1370_v32 }
 0x275   : > { %v1297_v33 = vpop.permute.xlu0 %1296  ;;  %v1149_v34 = vpop.permute.xlu1 %1148 }
 0x276   : > { %1167 = vst.msk [vmem:[#allocation5 + $0x30] sm:$0xff] %vm1160_vm3, %v1149_v34 }
 0x279   : > { %v1004_v35 = vpop.permute.xlu0 %1003  ;;  %v1198_v36 = vpop.permute.xlu1 %1197 }
 0x27a   : > { %1021 = vst.msk [vmem:[#allocation5 + $0x38] sm:$0xff] %vm1013_vm0, %v1004_v35 }
 0x27b   : > { %1216 = vst.msk [vmem:[#allocation5 + $0x30] sm:$0xff] %vm1209_vm4, %v1198_v36 }
 0x27c   : > { %1266 = vst.msk [vmem:[#allocation5 + $0x30] sm:$0xff] %vm1259_vm5, %v1248_v29 }
 0x27d   : > { %1315 = vst.msk [vmem:[#allocation5 + $0x30] sm:$0xff] %vm1308_vm6, %v1297_v33  ;;  %v1053_v0 = vpop.permute.xlu0 %1052  ;;  %v1348_v40 = vpop.permute.xlu1 %1347 }
 0x27e   : > { %1070 = vst.msk [vmem:[#allocation5 + $0x38] sm:$0xff] %vm1062_vm1, %v1053_v0 }
 0x27f   : > { %1119 = vst.msk [vmem:[#allocation5 + $0x38] sm:$0xff] %vm1111_vm2, %v1102_v25 }
 0x280   : > { %1168 = vst.msk [vmem:[#allocation5 + $0x38] sm:$0xff] %vm1160_vm3, %v1151_v27 }
 0x281   : > { %1217 = vst.msk [vmem:[#allocation5 + $0x38] sm:$0xff] %vm1209_vm4, %v1200_v28  ;;  %v1246_v39 = vpop.permute.xlu0 %1245 }
 0x282   : > { %1265 = vst.msk [vmem:[#allocation5 + $0x28] sm:$0xff] %vm1259_vm5, %v1246_v39  ;;  %1267 = vst.msk [vmem:[#allocation5 + $0x38] sm:$0xff] %vm1259_vm5, %v2256_v37 }
 0x283   : > { %1316 = vst.msk [vmem:[#allocation5 + $0x38] sm:$0xff] %vm1308_vm6, %v2262_v38  ;;  %v1656_v38 = vld [vmem:[%s2366_s4] ss:$0 sm:$0xff] }
 0x284   : > { %1365 = vst.msk [vmem:[#allocation5 + $0x38] sm:$0xff] %vm1357_vm7, %v1348_v40 }
 0x285   : > { %v1295_v41 = vpop.permute.xlu0 %1294 }
 0x286   : > { %1314 = vst.msk [vmem:[#allocation5 + $0x28] sm:$0xff] %vm1308_vm6, %v1295_v41 }
 0x289   : > { %v1344_v42 = vpop.permute.xlu0 %1343 }
 0x28a   : > { %1363 = vst.msk [vmem:[#allocation5 + $0x28] sm:$0xff] %vm1357_vm7, %v1344_v42 }
 0x28b   : > { %v1373_v45 = vld [vmem:[#allocation5 + $0x38] sm:$0xff] }
 0x28d   : > { %v1346_v43 = vpop.permute.xlu0 %1345 }
 0x28e   : > { %1364 = vst.msk [vmem:[#allocation5 + $0x30] sm:$0xff] %vm1357_vm7, %v1346_v43 }
 0x291   : > { %v1371_v44 = vld [vmem:[#allocation5 + $0x28] sm:$0xff] }
 0x292   : > { %1746 = vmatmul.mubr.msk.f32.gmra.mxu1 %vm1390_vm8, %v1371_v44 }
 0x295   : > { %v1372_v37 = vld [vmem:[#allocation5 + $0x30] sm:$0xff] }
 0x296   : > { %1748 = vmatprep.mubr.msk.f32.mxu1 %vm1390_vm8, %v1372_v37 }
 0x297   : > { %1749 = vmatmul.mubr.msk.f32.gmra.mxu1 %vm1390_vm8, %v1373_v45 }
 0x312   : > { %v1741_v46 = vpop.f32.mrf.mxu1 }
 0x313   : > { %v1487_v47 = vadd.f32 %v1741_v46, %v1656_v38 }
 0x314   : > { %v1481_v48 = vpop.f32.mrf.mxu1 }
 0x315   : > { %v1521_v49 = vmax.f32 %v1487_v47, 0.0  ;;  %v1482_v50 = vadd.f32 %v1656_v38, %v1481_v48 }
 0x317   : > { %1529 = vst.msk [vmem:[%s224_s20 + $0x8] sm:$0xff] %vm920_vm13, %v1521_v49  ;;  %v1520_v51 = vmax.f32 %v1482_v50, 0.0 }
 0x319   : > { %1528 = vst.msk [vmem:[%s224_s20] sm:$0xff] %vm920_vm13, %v1520_v51 }
 0x332   : > { %v1744_v52 = vpop.f32.mrf.mxu1 }
 0x333   : > { %v1497_v53 = vadd.f32 %v1744_v52, %v1656_v38 }
 0x334   : > { %v1491_v54 = vpop.f32.mrf.mxu1 }
 0x335   : > { %v1523_v55 = vmax.f32 %v1497_v53, 0.0  ;;  %v1492_v56 = vadd.f32 %v1656_v38, %v1491_v54 }
 0x337   : > { %1531 = vst.msk [vmem:[%s224_s20 + $0x18] sm:$0xff] %vm920_vm13, %v1523_v55  ;;  %v1522_v57 = vmax.f32 %v1492_v56, 0.0 }
 0x339   : > { %1530 = vst.msk [vmem:[%s224_s20 + $0x10] sm:$0xff] %vm920_vm13, %v1522_v57 }
 0x352   : > { %v1747_v58 = vpop.f32.mrf.mxu1 }
 0x353   : > { %v1507_v59 = vadd.f32 %v1747_v58, %v1656_v38 }
 0x354   : > { %v1501_v60 = vpop.f32.mrf.mxu1 }
 0x355   : > { %v1525_v61 = vmax.f32 %v1507_v59, 0.0  ;;  %v1502_v62 = vadd.f32 %v1656_v38, %v1501_v60 }
 0x357   : > { %1533 = vst.msk [vmem:[%s224_s20 + $0x28] sm:$0xff] %vm920_vm13, %v1525_v61  ;;  %v1524_v63 = vmax.f32 %v1502_v62, 0.0  ;;  %v1750_v1 = vpop.f32.mrf.mxu1 }
 0x358   : > { %v1517_v2 = vadd.f32 %v1750_v1, %v1656_v38 }
 0x359   : > { %1532 = vst.msk [vmem:[%s224_s20 + $0x20] sm:$0xff] %vm920_vm13, %v1524_v63  ;;  %v1511_v3 = vpop.f32.mrf.mxu1 }
 0x35a   : > { %v1527_v4 = vmax.f32 %v1517_v2, 0.0  ;;  %v1512_v5 = vadd.f32 %v1656_v38, %v1511_v3 }
 0x35c   : > { %1535 = vst.msk [vmem:[%s224_s20 + $0x38] sm:$0xff] %vm920_vm13, %v1527_v4  ;;  %v1526_v6 = vmax.f32 %v1512_v5, 0.0 }
 0x35e   : > { %1534 = vst.msk [vmem:[%s224_s20 + $0x30] sm:$0xff] %vm920_vm13, %v1526_v6 }
 0x35f PF: > { %s15_s18 = sadd.s32 1, %s1778_s18  }
 0x360   : > { %p12_p4 = scmp.ge.s32.totalorder %s15_s18, 4  }
 0x362   :  { %14 = sbr.rel (!%p12_p4) target bundleno = 1 (0x1), region = 107 }

</bundles_post_ra>
